<compile_context>
chip_gen: v7x
topology: tpu7x:2x2x1
jax: 0.10.0
libtpu: 0.0.40
codegen_flags: <defaults>
</compile_context>

<pallas_src>
import functools
import math

import numpy as np
import jax
import jax.numpy as jnp
from jax.experimental import pallas as pl
from jax.experimental.pallas import tpu as pltpu


# 32 MiB scoped VMEM is safe on every generation (v7x has only 64 MiB / TC);
# v5e/v6e could be raised to 64-96 MiB for even larger tiles if profiled.
_VMEM_LIMIT = 32 * 1024 * 1024

_NEG_BIG = -1e9   # matches the reference masked_fill(mask == 0, -1e9)


# ------------------------------ tiling helpers --------------------------------

def _tile_and_pad(dim, cap):
    """Return (tile, padded_dim).  Dims <= cap use a single full-dim tile
    (always legal); larger dims are zero-padded up to a multiple of `cap`
    (cap is a multiple of 8 and 128, so sub-tiles respect the (8,128) rule).
    This replaces the old full-dim fallback that could blow VMEM for a large
    vocab head."""
    if dim <= cap:
        return dim, dim
    if dim % cap == 0:
        return cap, dim
    return cap, ((dim + cap - 1) // cap) * cap


def _seq_tile(dim, cap, mult):
    """Largest multiple of `mult` dividing `dim` and <= cap, else full dim."""
    if dim <= cap or dim % mult != 0:
        return dim
    t = (cap // mult) * mult
    while t >= mult:
        if dim % t == 0:
            return t
        t -= mult
    return dim


# ------------------------------ Pallas kernels --------------------------------

def _matmul_kernel(x_ref, w_ref, b_ref, o_ref, acc_ref, *, relu):
    """o = x @ W + b (optional ReLU); bf16 operands, f32 VMEM accumulation."""
    @pl.when(pl.program_id(2) == 0)
    def _():
        acc_ref[...] = jnp.zeros_like(acc_ref)

    acc_ref[...] += jnp.dot(x_ref[...], w_ref[...],
                            preferred_element_type=jnp.float32)

    @pl.when(pl.program_id(2) == pl.num_programs(2) - 1)
    def _():
        y = acc_ref[...] + b_ref[...]
        if relu:
            y = jnp.maximum(y, 0.0)
        o_ref[...] = y.astype(o_ref.dtype)


def _matmul_add_ln_kernel(x_ref, w_ref, b_ref, r_ref, g_ref, bb_ref,
                          o_ref, acc_ref, *, eps):
    """o = LayerNorm(x @ W + b + residual) * gamma + beta, fused epilogue.
    LN math in f32; bf16 output."""
    @pl.when(pl.program_id(2) == 0)
    def _():
        acc_ref[...] = jnp.zeros_like(acc_ref)

    acc_ref[...] += jnp.dot(x_ref[...], w_ref[...],
                            preferred_element_type=jnp.float32)

    @pl.when(pl.program_id(2) == pl.num_programs(2) - 1)
    def _():
        y = acc_ref[...] + b_ref[...] + r_ref[...].astype(jnp.float32)
        mu = jnp.mean(y, axis=-1, keepdims=True)
        var = jnp.mean((y - mu) * (y - mu), axis=-1, keepdims=True)
        o_ref[...] = ((y - mu) * jax.lax.rsqrt(var + eps) * g_ref[...]
                      + bb_ref[...]).astype(o_ref.dtype)


def _flash_attn_kernel(*args, causal, use_qv, use_kv):
    """Flash-style online-softmax attention for one (batch, head, q-block).

    args = q_ref, k_ref, v_ref, [q_valid_ref], [k_valid_ref],
           o_ref, m_ref, l_ref, acc_ref
    q/k/v refs are head-major (1,1,1,tile,dh) bf16 blocks of the packed
    projection tensors; the softmax scale is already folded into Wq.
    """
    i = 3
    q_ref, k_ref, v_ref = args[0], args[1], args[2]
    qv_ref = kv_ref = None
    if use_qv:
        qv_ref = args[i]; i += 1
    if use_kv:
        kv_ref = args[i]; i += 1
    o_ref = args[i]
    m_ref, l_ref, acc_ref = args[i + 1], args[i + 2], args[i + 3]

    qi = pl.program_id(2)
    ki = pl.program_id(3)
    tq = q_ref.shape[3]
    tk = k_ref.shape[3]

    @pl.when(ki == 0)
    def _():
        m_ref[...] = jnp.full(m_ref.shape, -1e30, dtype=m_ref.dtype)
        l_ref[...] = jnp.zeros_like(l_ref)
        acc_ref[...] = jnp.zeros_like(acc_ref)

    def update():
        q = q_ref[0, 0, 0]                    # (tq, dh) bf16 (scale folded in)
        k = k_ref[0, 0, 0]                    # (tk, dh) bf16
        v = v_ref[0, 0, 0]                    # (tk, dh) bf16

        s = jax.lax.dot_general(q, k, (((1,), (1,)), ((), ())),
                                preferred_element_type=jnp.float32)  # (tq, tk)

        valid = None
        if use_kv:
            valid = kv_ref[0] > 0.5                          # (1, tk)
        if use_qv:
            qv = qv_ref[0] > 0.5                             # (tq, 1)
            valid = qv if valid is None else jnp.logical_and(valid, qv)
        if causal:
            rows = jax.lax.broadcasted_iota(jnp.int32, (tq, tk), 0) + qi * tq
            cols = jax.lax.broadcasted_iota(jnp.int32, (tq, tk), 1) + ki * tk
            c = cols <= rows
            valid = c if valid is None else jnp.logical_and(valid, c)
        if valid is not None:
            s = jnp.where(valid, s, _NEG_BIG)

        m_prev = m_ref[...]
        m_new = jnp.maximum(m_prev, jnp.max(s, axis=-1, keepdims=True))
        alpha = jnp.exp(m_prev - m_new)
        p = jnp.exp(s - m_new)
        l_ref[...] = alpha * l_ref[...] + jnp.sum(p, axis=-1, keepdims=True)
        acc_ref[...] = alpha * acc_ref[...] + jax.lax.dot_general(
            p.astype(jnp.bfloat16), v, (((1,), (0,)), ((), ())),
            preferred_element_type=jnp.float32)
        m_ref[...] = m_new

    if causal:
        # Skip key blocks that are entirely above the diagonal.
        @pl.when(ki * tk <= qi * tq + (tq - 1))
        def _():
            update()
    else:
        update()

    @pl.when(ki == pl.num_programs(3) - 1)
    def _():
        o_ref[0, 0] = (acc_ref[...] *
                       pl.reciprocal(l_ref[...], approx=True)).astype(o_ref.dtype)


# ------------------------------ kernel wrappers --------------------------------

def linear(x, w, b, *, relu=False, out_dtype=jnp.bfloat16):
    """y = x @ W + b (optional ReLU).  x: (M,K) bf16, w: (K,N) bf16, b: (N,) f32."""
    M, K = x.shape
    N = w.shape[1]
    tm, Mp = _tile_and_pad(M, 512)
    tn, Np = _tile_and_pad(N, 512)
    tk, Kp = _tile_and_pad(K, 2048)
    if (Mp, Kp) != (M, K):
        x = jnp.pad(x, ((0, Mp - M), (0, Kp - K)))
    if (Kp, Np) != (K, N):
        w = jnp.pad(w, ((0, Kp - K), (0, Np - N)))
    if Np != N:
        b = jnp.pad(b, (0, Np - N))
    grid = (Mp // tm, Np // tn, Kp // tk)
    # NOTE(v5e): if weight-stream DMA is exposed at small M, add
    # pipeline_mode=pl.Buffered(3) to the weight BlockSpec.
    out = pl.pallas_call(
        functools.partial(_matmul_kernel, relu=relu),
        grid=grid,
        in_specs=[
            pl.BlockSpec((tm, tk), lambda i, j, k: (i, k)),
            pl.BlockSpec((tk, tn), lambda i, j, k: (k, j)),
            pl.BlockSpec((1, tn), lambda i, j, k: (0, j)),
        ],
        out_specs=pl.BlockSpec((tm, tn), lambda i, j, k: (i, j)),
        out_shape=jax.ShapeDtypeStruct((Mp, Np), out_dtype),
        scratch_shapes=[pltpu.VMEM((tm, tn), jnp.float32)],
        compiler_params=pltpu.CompilerParams(
            dimension_semantics=("parallel", "parallel", "arbitrary"),
            vmem_limit_bytes=_VMEM_LIMIT),
    )(x, w, b.reshape(1, Np))
    if (Mp, Np) != (M, N):
        out = out[:M, :N]
    return out


def linear_add_ln(x, w, b, residual, gamma, beta, eps=1e-5):
    """y = LayerNorm(x @ W + b + residual) * gamma + beta.  N kept in one tile
    (LayerNorm reduces over the full feature dim); bf16 output."""
    M, K = x.shape
    N = w.shape[1]
    tm, Mp = _tile_and_pad(M, 512)
    tk, Kp = _tile_and_pad(K, 2048)
    if (Mp, Kp) != (M, K):
        x = jnp.pad(x, ((0, Mp - M), (0, Kp - K)))
    if Kp != K:
        w = jnp.pad(w, ((0, Kp - K), (0, 0)))
    if Mp != M:
        residual = jnp.pad(residual, ((0, Mp - M), (0, 0)))
    grid = (Mp // tm, 1, Kp // tk)
    out = pl.pallas_call(
        functools.partial(_matmul_add_ln_kernel, eps=eps),
        grid=grid,
        in_specs=[
            pl.BlockSpec((tm, tk), lambda i, j, k: (i, k)),
            pl.BlockSpec((tk, N), lambda i, j, k: (k, 0)),
            pl.BlockSpec((1, N), lambda i, j, k: (0, 0)),
            pl.BlockSpec((tm, N), lambda i, j, k: (i, 0)),
            pl.BlockSpec((1, N), lambda i, j, k: (0, 0)),
            pl.BlockSpec((1, N), lambda i, j, k: (0, 0)),
        ],
        out_specs=pl.BlockSpec((tm, N), lambda i, j, k: (i, 0)),
        out_shape=jax.ShapeDtypeStruct((Mp, N), jnp.bfloat16),
        scratch_shapes=[pltpu.VMEM((tm, N), jnp.float32)],
        compiler_params=pltpu.CompilerParams(
            dimension_semantics=("parallel", "parallel", "arbitrary"),
            vmem_limit_bytes=_VMEM_LIMIT),
    )(x, w, b.reshape(1, N), residual, gamma.reshape(1, N), beta.reshape(1, N))
    if Mp != M:
        out = out[:M]
    return out


def flash_attention(q_pack, kv_pack, *, q_idx, k_idx, v_idx,
                    q_valid=None, k_valid=None, causal=False):
    """q_pack: (Pq,B,H,Sq,dh) bf16; kv_pack: (Pk,B,H,Sk,dh) bf16 (packed,
    head-major).  q_valid: (B,Sq) f32 or None; k_valid: (B,Sk) f32 or None.
    Returns (B,H,Sq,dh) bf16."""
    _, B, H, Sq, dh = q_pack.shape
    Sk = kv_pack.shape[3]
    tq = _seq_tile(Sq, 128, 8)
    tk = _seq_tile(Sk, 128, 128)
    grid = (B, H, Sq // tq, Sk // tk)

    in_specs = [
        pl.BlockSpec((1, 1, 1, tq, dh), lambda b, h, qi, ki: (q_idx, b, h, qi, 0)),
        pl.BlockSpec((1, 1, 1, tk, dh), lambda b, h, qi, ki: (k_idx, b, h, ki, 0)),
        pl.BlockSpec((1, 1, 1, tk, dh), lambda b, h, qi, ki: (v_idx, b, h, ki, 0)),
    ]
    operands = [q_pack, kv_pack, kv_pack]
    if q_valid is not None:
        in_specs.append(pl.BlockSpec((1, tq, 1), lambda b, h, qi, ki: (b, qi, 0)))
        operands.append(q_valid.reshape(B, Sq, 1))
    if k_valid is not None:
        in_specs.append(pl.BlockSpec((1, 1, tk), lambda b, h, qi, ki: (b, 0, ki)))
        operands.append(k_valid.reshape(B, 1, Sk))

    kern = functools.partial(_flash_attn_kernel, causal=causal,
                             use_qv=q_valid is not None,
                             use_kv=k_valid is not None)
    return pl.pallas_call(
        kern,
        grid=grid,
        in_specs=in_specs,
        out_specs=pl.BlockSpec((1, 1, tq, dh), lambda b, h, qi, ki: (b, h, qi, 0)),
        out_shape=jax.ShapeDtypeStruct((B, H, Sq, dh), jnp.bfloat16),
        scratch_shapes=[pltpu.VMEM((tq, 1), jnp.float32),
                        pltpu.VMEM((tq, 1), jnp.float32),
                        pltpu.VMEM((tq, dh), jnp.float32)],
        compiler_params=pltpu.CompilerParams(
            dimension_semantics=("parallel", "parallel", "parallel", "arbitrary"),
            vmem_limit_bytes=_VMEM_LIMIT),
    )(*operands)


# ------------------------------ model (glue) ----------------------------------

def self_attention(x, q_valid, k_valid, p, n_heads, causal):
    B, S, D = x.shape
    dh = D // n_heads
    # Fused Q|K|V projection (scale folded into the Q columns at init).
    qkv = linear(x.reshape(B * S, D), p['w_qkv'], p['b_qkv'])          # (B*S, 3D) bf16
    # Head-major packing: heads / Q / K / V are selected by BlockSpec indices
    # inside the attention kernel (no XLA slicing, no sub-128-lane head slices).
    qkv_h = jnp.transpose(qkv.reshape(B, S, 3, n_heads, dh),
                          (2, 0, 3, 1, 4))                             # (3,B,H,S,dh)
    o = flash_attention(qkv_h, qkv_h, q_idx=0, k_idx=1, v_idx=2,
                        q_valid=q_valid, k_valid=k_valid, causal=causal)
    return jnp.transpose(o, (0, 2, 1, 3)).reshape(B * S, D)            # bf16


def cross_attention(x_q, x_kv, k_valid, p, n_heads):
    B, Sq, D = x_q.shape
    Sk = x_kv.shape[1]
    dh = D // n_heads
    q = linear(x_q.reshape(B * Sq, D), p['wq'], p['bq'])               # (B*Sq, D)
    kv = linear(x_kv.reshape(B * Sk, D), p['w_kv'], p['b_kv'])         # (B*Sk, 2D)
    q_h = jnp.transpose(q.reshape(B, Sq, 1, n_heads, dh), (2, 0, 3, 1, 4))
    kv_h = jnp.transpose(kv.reshape(B, Sk, 2, n_heads, dh), (2, 0, 3, 1, 4))
    o = flash_attention(q_h, kv_h, q_idx=0, k_idx=0, v_idx=1,
                        q_valid=None, k_valid=k_valid, causal=False)
    return jnp.transpose(o, (0, 2, 1, 3)).reshape(B * Sq, D)


def encoder_layer(x, src_valid, p, n_heads):
    B, S, D = x.shape
    x2d = x.reshape(B * S, D)
    a = self_attention(x, None, src_valid, p['self_attn'], n_heads, causal=False)
    x2d = linear_add_ln(a, p['self_attn']['wo'], p['self_attn']['bo'], x2d,
                        p['ln1_g'], p['ln1_b'])
    h = linear(x2d, p['ffn']['w1'], p['ffn']['b1'], relu=True)
    x2d = linear_add_ln(h, p['ffn']['w2'], p['ffn']['b2'], x2d,
                        p['ln2_g'], p['ln2_b'])
    return x2d.reshape(B, S, D)


def decoder_layer(x, enc_out, tgt_valid, src_valid, p, n_heads):
    B, S, D = x.shape
    x2d = x.reshape(B * S, D)
    a = self_attention(x, tgt_valid, None, p['self_attn'], n_heads, causal=True)
    x2d = linear_add_ln(a, p['self_attn']['wo'], p['self_attn']['bo'], x2d,
                        p['ln1_g'], p['ln1_b'])
    c = cross_attention(x2d.reshape(B, S, D), enc_out, src_valid,
                        p['cross_attn'], n_heads)
    x2d = linear_add_ln(c, p['cross_attn']['wo'], p['cross_attn']['bo'], x2d,
                        p['ln2_g'], p['ln2_b'])
    h = linear(x2d, p['ffn']['w1'], p['ffn']['b1'], relu=True)
    x2d = linear_add_ln(h, p['ffn']['w2'], p['ffn']['b2'], x2d,
                        p['ln3_g'], p['ln3_b'])
    return x2d.reshape(B, S, D)


def positional_encoding(max_len, d_model):
    pos = np.arange(max_len)[:, None].astype(np.float32)
    i = np.arange(d_model)[None, :]
    angle = pos / np.power(10000.0, (2 * (i // 2)) / np.float32(d_model))
    pe = np.where(i % 2 == 0, np.sin(angle), np.cos(angle))
    return jnp.asarray(pe, jnp.float32)


def pre_layer(tokens, emb, pe, d_model):
    # Embedding gather + sinusoidal PE (glue in XLA; not a dense hot path).
    x = jnp.take(emb, tokens, axis=0) * math.sqrt(d_model)
    x = x + pe[None, :tokens.shape[1], :]
    # TODO(synk): dropout omitted — forward implemented with eval/inference semantics.
    return x.astype(jnp.bfloat16)


def transformer_forward(params, enc_tokens, dec_tokens, *, n_heads, d_model):
    B, Ss = enc_tokens.shape
    St = dec_tokens.shape[1]

    # Tiny per-position validity vectors; the (Sq, Sk) masks (incl. causal) are
    # built inside the attention kernel and dropped entirely on all-valid sides.
    src_valid = (enc_tokens != 0).astype(jnp.float32)   # keys of enc self-attn / cross-attn
    tgt_valid = (dec_tokens != 0).astype(jnp.float32)   # query rows of dec self-attn

    enc_x = pre_layer(enc_tokens, params['embedding'], params['pe'], d_model)
    for lp in params['encoder']:
        enc_x = encoder_layer(enc_x, src_valid, lp, n_heads)

    dec_x = pre_layer(dec_tokens, params['embedding'], params['pe'], d_model)
    for lp in params['decoder']:
        dec_x = decoder_layer(dec_x, enc_x, tgt_valid, src_valid, lp, n_heads)

    D = dec_x.shape[-1]
    logits = linear(dec_x.reshape(B * St, D), params['head_w'], params['head_b'],
                    out_dtype=jnp.float32)
    return logits.reshape(B, St, -1)


# ------------------------------ parameter init --------------------------------

def _xavier(key, fan_in, fan_out, shape):
    bound = math.sqrt(6.0 / (fan_in + fan_out))
    return jax.random.uniform(key, shape, jnp.float32, -bound, bound)


def init_params(key, dict_size, d_model, n, dff, n_heads, max_len):
    keys = iter(jax.random.split(key, 4096))
    scale = 1.0 / math.sqrt(d_model // n_heads)  # folded into the Q projection

    def lin(din, dout):
        w = _xavier(next(keys), din, dout, (din, dout))
        b = jnp.zeros((dout,), jnp.float32)
        return w, b

    def self_attn_params():
        wq, bq = lin(d_model, d_model)
        wk, bk = lin(d_model, d_model)
        wv, bv = lin(d_model, d_model)
        wo, bo = lin(d_model, d_model)
        return dict(
            w_qkv=jnp.concatenate([wq * scale, wk, wv], axis=1).astype(jnp.bfloat16),
            b_qkv=jnp.concatenate([bq * scale, bk, bv]),
            wo=wo.astype(jnp.bfloat16), bo=bo)

    def cross_attn_params():
        wq, bq = lin(d_model, d_model)
        wk, bk = lin(d_model, d_model)
        wv, bv = lin(d_model, d_model)
        wo, bo = lin(d_model, d_model)
        return dict(
            wq=(wq * scale).astype(jnp.bfloat16), bq=bq * scale,
            w_kv=jnp.concatenate([wk, wv], axis=1).astype(jnp.bfloat16),
            b_kv=jnp.concatenate([bk, bv]),
            wo=wo.astype(jnp.bfloat16), bo=bo)

    def enc_layer():
        w1, b1 = lin(d_model, dff)
        w2, b2 = lin(dff, d_model)
        return dict(self_attn=self_attn_params(),
                    ffn=dict(w1=w1.astype(jnp.bfloat16), b1=b1,
                             w2=w2.astype(jnp.bfloat16), b2=b2),
                    ln1_g=jnp.ones((d_model,), jnp.float32),
                    ln1_b=jnp.zeros((d_model,), jnp.float32),
                    ln2_g=jnp.ones((d_model,), jnp.float32),
                    ln2_b=jnp.zeros((d_model,), jnp.float32))

    def dec_layer():
        d = enc_layer()
        d['cross_attn'] = cross_attn_params()
        d['ln3_g'] = jnp.ones((d_model,), jnp.float32)
        d['ln3_b'] = jnp.zeros((d_model,), jnp.float32)
        return d

    head_w, head_b = lin(d_model, dict_size)
    return dict(
        embedding=_xavier(next(keys), dict_size, d_model, (dict_size, d_model)),
        pe=positional_encoding(max_len, d_model),
        encoder=[enc_layer() for _ in range(n)],
        decoder=[dec_layer() for _ in range(n)],
        head_w=head_w.astype(jnp.bfloat16), head_b=head_b,
    )


# ----------------------------------- main --------------------------------------

if __name__ == "__main__":
    dict_size, d_model, n, dff, n_heads, p_dropout = 16, 32, 2, 64, 4, 0.1
    B, S = 2, 8

    key = jax.random.PRNGKey(0)
    k_par, k_src, k_tgt = jax.random.split(key, 3)
    params = init_params(k_par, dict_size, d_model, n, dff, n_heads, max_len=64)

    encoder_input = jax.random.randint(k_src, (B, S), 0, dict_size, dtype=jnp.int32)
    decoder_input = jax.random.randint(k_tgt, (B, S), 0, dict_size, dtype=jnp.int32)

    fwd = jax.jit(functools.partial(transformer_forward,
                                    n_heads=n_heads, d_model=d_model))
    out = fwd(params, encoder_input, decoder_input)
    jax.block_until_ready(out)

    assert out.shape == (B, S, dict_size), out.shape
    assert bool(jnp.all(jnp.isfinite(out)))
    print("KERNEL_OK")
</pallas_src>

<mosaic_0001>
module attributes {stable_mosaic.version = 11 : i64} {
  func.func @_matmul_kernel(%arg0: i32, %arg1: i32, %arg2: i32, %arg3: memref<16x32xbf16, #tpu.memory_space<vmem>>, %arg4: memref<32x96xbf16, #tpu.memory_space<vmem>>, %arg5: memref<1x96xf32, #tpu.memory_space<vmem>>, %arg6: memref<16x96xbf16, #tpu.memory_space<vmem>>, %arg7: memref<16x96xf32, #tpu.memory_space<vmem>>) attributes {dimension_semantics = [#tpu.dimension_semantics<parallel>, #tpu.dimension_semantics<parallel>, #tpu.dimension_semantics<arbitrary>], iteration_bounds = array<i64: 1, 1, 1>, scalar_prefetch = 0 : i64, scratch_operands = 1 : i64, tpu.core_type = #tpu.core_type<tc>, window_params = [{transform_indices = @transform_0, window_bounds = array<i64: 16, 32>}, {transform_indices = @transform_1, window_bounds = array<i64: 32, 96>}, {transform_indices = @transform_2, window_bounds = array<i64: 1, 96>}, {transform_indices = @transform_3, window_bounds = array<i64: 16, 96>}]} {
    %c0_i32 = arith.constant 0 : i32
    %0 = arith.cmpi eq, %arg2, %c0_i32 : i32
    %1 = arith.extui %0 : i1 to i32
    %c0_i32_0 = arith.constant 0 : i32
    %2 = arith.cmpi ne, %1, %c0_i32_0 : i32
    scf.if %2 {
      %cst_10 = arith.constant 0.000000e+00 : f32
      %12 = vector.broadcast %cst_10 : f32 to vector<16x96xf32>
      %c0_11 = arith.constant 0 : index
      %c0_12 = arith.constant 0 : index
      %13 = vector.load %arg7[%c0_11, %c0_12] : memref<16x96xf32, #tpu.memory_space<vmem>>, vector<16x96xf32>
      tpu.vector_store %arg7[%c0_11, %c0_12], %12 {strides = array<i32>} : memref<16x96xf32, #tpu.memory_space<vmem>>, vector<16x96xf32>,
    } else {
    }
    %c0 = arith.constant 0 : index
    %c0_1 = arith.constant 0 : index
    %3 = vector.load %arg7[%c0, %c0_1] : memref<16x96xf32, #tpu.memory_space<vmem>>, vector<16x96xf32>
    %c0_2 = arith.constant 0 : index
    %c0_3 = arith.constant 0 : index
    %4 = vector.load %arg3[%c0_2, %c0_3] : memref<16x32xbf16, #tpu.memory_space<vmem>>, vector<16x32xbf16>
    %c0_4 = arith.constant 0 : index
    %c0_5 = arith.constant 0 : index
    %5 = vector.load %arg4[%c0_4, %c0_5] : memref<32x96xbf16, #tpu.memory_space<vmem>>, vector<32x96xbf16>
    %cst = arith.constant dense<0.000000e+00> : vector<16x96xf32>
    %6 = tpu.matmul %4, %5, %cst {dimension_numbers = #tpu.dot_dimension_numbers<[1], [0], [0], [1], [0, 0, 1, 1], [], []>} : vector<16x32xbf16>, vector<32x96xbf16>, vector<16x96xf32> -> vector<16x96xf32>
    %7 = arith.addf %3, %6 : vector<16x96xf32>
    %c0_6 = arith.constant 0 : index
    %c0_7 = arith.constant 0 : index
    %8 = vector.load %arg7[%c0_6, %c0_7] : memref<16x96xf32, #tpu.memory_space<vmem>>, vector<16x96xf32>
    tpu.vector_store %arg7[%c0_6, %c0_7], %7 {strides = array<i32>} : memref<16x96xf32, #tpu.memory_space<vmem>>, vector<16x96xf32>,
    %c0_i32_8 = arith.constant 0 : i32
    %9 = arith.cmpi eq, %arg2, %c0_i32_8 : i32
    %10 = arith.extui %9 : i1 to i32
    %c0_i32_9 = arith.constant 0 : i32
    %11 = arith.cmpi ne, %10, %c0_i32_9 : i32
    scf.if %11 {
      %c0_10 = arith.constant 0 : index
      %c0_11 = arith.constant 0 : index
      %12 = vector.load %arg7[%c0_10, %c0_11] : memref<16x96xf32, #tpu.memory_space<vmem>>, vector<16x96xf32>
      %c0_12 = arith.constant 0 : index
      %c0_13 = arith.constant 0 : index
      %13 = vector.load %arg5[%c0_12, %c0_13] : memref<1x96xf32, #tpu.memory_space<vmem>>, vector<1x96xf32>
      %14 = vector.broadcast %13 : vector<1x96xf32> to vector<16x96xf32>
      %15 = arith.addf %12, %14 : vector<16x96xf32>
      %16 = arith.truncf %15 : vector<16x96xf32> to vector<16x96xbf16>
      %c0_14 = arith.constant 0 : index
      %c0_15 = arith.constant 0 : index
      %17 = vector.load %arg6[%c0_14, %c0_15] : memref<16x96xbf16, #tpu.memory_space<vmem>>, vector<16x96xbf16>
      tpu.vector_store %arg6[%c0_14, %c0_15], %16 {strides = array<i32>} : memref<16x96xbf16, #tpu.memory_space<vmem>>, vector<16x96xbf16>,
    } else {
    }
    return
  }
  func.func @transform_0(%arg0: i32, %arg1: i32, %arg2: i32) -> (i32, i32) {
    %c0_i32 = arith.constant 0 : i32
    return %arg0, %arg2 : i32, i32
  }
  func.func @transform_1(%arg0: i32, %arg1: i32, %arg2: i32) -> (i32, i32) {
    %c0_i32 = arith.constant 0 : i32
    return %arg2, %arg1 : i32, i32
  }
  func.func @transform_2(%arg0: i32, %arg1: i32, %arg2: i32) -> (i32, i32) {
    %c0_i32 = arith.constant 0 : i32
    %c0_i32_0 = arith.constant 0 : i32
    return %c0_i32, %arg1 : i32, i32
  }
  func.func @transform_3(%arg0: i32, %arg1: i32, %arg2: i32) -> (i32, i32) {
    %c0_i32 = arith.constant 0 : i32
    return %arg0, %arg1 : i32, i32
  }
}

module attributes {stable_mosaic.version = 11 : i64} {
  func.func @_flash_attn_kernel(%arg0: i32, %arg1: i32, %arg2: i32, %arg3: i32, %arg4: memref<1x1x1x8x8xbf16, #tpu.memory_space<vmem>>, %arg5: memref<1x1x1x8x8xbf16, #tpu.memory_space<vmem>>, %arg6: memref<1x1x1x8x8xbf16, #tpu.memory_space<vmem>>, %arg7: memref<1x8x1xf32, #tpu.memory_space<vmem>>, %arg8: memref<1x1x8x8xbf16, #tpu.memory_space<vmem>>, %arg9: memref<8x1xf32, #tpu.memory_space<vmem>>, %arg10: memref<8x1xf32, #tpu.memory_space<vmem>>, %arg11: memref<8x8xf32, #tpu.memory_space<vmem>>) attributes {dimension_semantics = [#tpu.dimension_semantics<parallel>, #tpu.dimension_semantics<parallel>, #tpu.dimension_semantics<parallel>, #tpu.dimension_semantics<arbitrary>], iteration_bounds = array<i64: 2, 4, 1, 1>, scalar_prefetch = 0 : i64, scratch_operands = 3 : i64, tpu.core_type = #tpu.core_type<tc>, window_params = [{transform_indices = @transform_0, window_bounds = array<i64: 1, 1, 1, 8, 8>}, {transform_indices = @transform_1, window_bounds = array<i64: 1, 1, 1, 8, 8>}, {transform_indices = @transform_2, window_bounds = array<i64: 1, 1, 1, 8, 8>}, {transform_indices = @transform_3, window_bounds = array<i64: 1, 8, 1>}, {transform_indices = @transform_4, window_bounds = array<i64: 1, 1, 8, 8>}]} {
    %c0_i32 = arith.constant 0 : i32
    %0 = arith.cmpi eq, %arg3, %c0_i32 : i32
    %1 = arith.extui %0 : i1 to i32
    %c0_i32_0 = arith.constant 0 : i32
    %2 = arith.cmpi ne, %1, %c0_i32_0 : i32
    scf.if %2 {
      %cst = arith.constant -1.000000e+30 : f32
      %12 = vector.broadcast %cst : f32 to vector<8x1xf32>
      %c0 = arith.constant 0 : index
      %c0_5 = arith.constant 0 : index
      %13 = vector.load %arg9[%c0, %c0_5] : memref<8x1xf32, #tpu.memory_space<vmem>>, vector<8x1xf32>
      tpu.vector_store %arg9[%c0, %c0_5], %12 {strides = array<i32>} : memref<8x1xf32, #tpu.memory_space<vmem>>, vector<8x1xf32>,
      %cst_6 = arith.constant 0.000000e+00 : f32
      %14 = vector.broadcast %cst_6 : f32 to vector<8x1xf32>
      %c0_7 = arith.constant 0 : index
      %c0_8 = arith.constant 0 : index
      %15 = vector.load %arg10[%c0_7, %c0_8] : memref<8x1xf32, #tpu.memory_space<vmem>>, vector<8x1xf32>
      tpu.vector_store %arg10[%c0_7, %c0_8], %14 {strides = array<i32>} : memref<8x1xf32, #tpu.memory_space<vmem>>, vector<8x1xf32>,
      %cst_9 = arith.constant 0.000000e+00 : f32
      %16 = vector.broadcast %cst_9 : f32 to vector<8x8xf32>
      %c0_10 = arith.constant 0 : index
      %c0_11 = arith.constant 0 : index
      %17 = vector.load %arg11[%c0_10, %c0_11] : memref<8x8xf32, #tpu.memory_space<vmem>>, vector<8x8xf32>
      tpu.vector_store %arg11[%c0_10, %c0_11], %16 {strides = array<i32>} : memref<8x8xf32, #tpu.memory_space<vmem>>, vector<8x8xf32>,
    } else {
    }
    %c8_i32 = arith.constant 8 : i32
    %3 = arith.muli %arg3, %c8_i32 : i32
    %c8_i32_1 = arith.constant 8 : i32
    %4 = arith.muli %arg2, %c8_i32_1 : i32
    %c7_i32 = arith.constant 7 : i32
    %5 = arith.addi %4, %c7_i32 : i32
    %6 = arith.cmpi sle, %3, %5 : i32
    %7 = arith.extui %6 : i1 to i32
    %c0_i32_2 = arith.constant 0 : i32
    %8 = arith.cmpi ne, %7, %c0_i32_2 : i32
    scf.if %8 {
      %c0 = arith.constant 0 : index
      %c0_5 = arith.constant 0 : index
      %c0_6 = arith.constant 0 : index
      %c0_7 = arith.constant 0 : index
      %c0_8 = arith.constant 0 : index
      %12 = vector.load %arg4[%c0, %c0_5, %c0_6, %c0_7, %c0_8] : memref<1x1x1x8x8xbf16, #tpu.memory_space<vmem>>, vector<1x1x1x8x8xbf16>
      %13 = vector.shape_cast %12 : vector<1x1x1x8x8xbf16> to vector<8x8xbf16>
      %c0_9 = arith.constant 0 : index
      %c0_10 = arith.constant 0 : index
      %c0_11 = arith.constant 0 : index
      %c0_12 = arith.constant 0 : index
      %c0_13 = arith.constant 0 : index
      %14 = vector.load %arg5[%c0_9, %c0_10, %c0_11, %c0_12, %c0_13] : memref<1x1x1x8x8xbf16, #tpu.memory_space<vmem>>, vector<1x1x1x8x8xbf16>
      %15 = vector.shape_cast %14 : vector<1x1x1x8x8xbf16> to vector<8x8xbf16>
      %c0_14 = arith.constant 0 : index
      %c0_15 = arith.constant 0 : index
      %c0_16 = arith.constant 0 : index
      %c0_17 = arith.constant 0 : index
      %c0_18 = arith.constant 0 : index
      %16 = vector.load %arg6[%c0_14, %c0_15, %c0_16, %c0_17, %c0_18] : memref<1x1x1x8x8xbf16, #tpu.memory_space<vmem>>, vector<1x1x1x8x8xbf16>
      %17 = vector.shape_cast %16 : vector<1x1x1x8x8xbf16> to vector<8x8xbf16>
      %cst = arith.constant dense<0.000000e+00> : vector<8x8xf32>
      %18 = tpu.matmul %13, %15, %cst {dimension_numbers = #tpu.dot_dimension_numbers<[1], [1], [0], [0], [0, 0, 1, 0], [], []>} : vector<8x8xbf16>, vector<8x8xbf16>, vector<8x8xf32> -> vector<8x8xf32>
      %c0_19 = arith.constant 0 : index
      %c0_20 = arith.constant 0 : index
      %c0_21 = arith.constant 0 : index
      %19 = vector.load %arg7[%c0_19, %c0_20, %c0_21] : memref<1x8x1xf32, #tpu.memory_space<vmem>>, vector<1x8x1xf32>
      %20 = vector.shape_cast %19 : vector<1x8x1xf32> to vector<8x1xf32>
      %cst_22 = arith.constant 5.000000e-01 : f32
      %21 = vector.broadcast %cst_22 : f32 to vector<8x1xf32>
      %22 = arith.cmpf ogt, %20, %21 : vector<8x1xf32>
      %23 = tpu.iota {dimensions = array<i32: 0>} : vector<8x8xi32>
      %c8_i32_23 = arith.constant 8 : i32
      %24 = arith.muli %arg2, %c8_i32_23 : i32
      %25 = vector.broadcast %24 : i32 to vector<8x8xi32>
      %26 = arith.addi %23, %25 : vector<8x8xi32>
      %27 = tpu.iota {dimensions = array<i32: 1>} : vector<8x8xi32>
      %c8_i32_24 = arith.constant 8 : i32
      %28 = arith.muli %arg3, %c8_i32_24 : i32
      %29 = vector.broadcast %28 : i32 to vector<8x8xi32>
      %30 = arith.addi %27, %29 : vector<8x8xi32>
      %31 = arith.cmpi sle, %30, %26 : vector<8x8xi32>
      %32 = vector.broadcast %22 : vector<8x1xi1> to vector<8x8xi1>
      %33 = arith.andi %32, %31 : vector<8x8xi1>
      %cst_25 = arith.constant -1.000000e+09 : f32
      %34 = vector.broadcast %cst_25 : f32 to vector<8x8xf32>
      %35 = arith.select %33, %18, %34 : vector<8x8xi1>, vector<8x8xf32>
      %c0_26 = arith.constant 0 : index
      %c0_27 = arith.constant 0 : index
      %36 = vector.load %arg9[%c0_26, %c0_27] : memref<8x1xf32, #tpu.memory_space<vmem>>, vector<8x1xf32>
      %cst_28 = arith.constant dense<0xFF800000> : vector<8xf32>
      %37 = vector.multi_reduction <maximumf>, %35, %cst_28 [1] : vector<8x8xf32> to vector<8xf32>
      %38 = vector.shape_cast %37 : vector<8xf32> to vector<8x1xf32>
      %39 = arith.maximumf %36, %38 : vector<8x1xf32>
      %40 = arith.subf %36, %39 : vector<8x1xf32>
      %41 = math.exp %40 : vector<8x1xf32>
      %42 = vector.broadcast %39 : vector<8x1xf32> to vector<8x8xf32>
      %43 = arith.subf %35, %42 : vector<8x8xf32>
      %44 = math.exp %43 : vector<8x8xf32>
      %c0_29 = arith.constant 0 : index
      %c0_30 = arith.constant 0 : index
      %45 = vector.load %arg10[%c0_29, %c0_30] : memref<8x1xf32, #tpu.memory_space<vmem>>, vector<8x1xf32>
      %46 = arith.mulf %41, %45 : vector<8x1xf32>
      %cst_31 = arith.constant dense<0.000000e+00> : vector<8xf32>
      %47 = vector.multi_reduction <add>, %44, %cst_31 [1] : vector<8x8xf32> to vector<8xf32>
      %48 = vector.shape_cast %47 : vector<8xf32> to vector<8x1xf32>
      %49 = arith.addf %46, %48 : vector<8x1xf32>
      %c0_32 = arith.constant 0 : index
      %c0_33 = arith.constant 0 : index
      %50 = vector.load %arg10[%c0_32, %c0_33] : memref<8x1xf32, #tpu.memory_space<vmem>>, vector<8x1xf32>
      tpu.vector_store %arg10[%c0_32, %c0_33], %49 {strides = array<i32>} : memref<8x1xf32, #tpu.memory_space<vmem>>, vector<8x1xf32>,
      %c0_34 = arith.constant 0 : index
      %c0_35 = arith.constant 0 : index
      %51 = vector.load %arg11[%c0_34, %c0_35] : memref<8x8xf32, #tpu.memory_space<vmem>>, vector<8x8xf32>
      %52 = vector.broadcast %41 : vector<8x1xf32> to vector<8x8xf32>
      %53 = arith.mulf %52, %51 : vector<8x8xf32>
      %54 = arith.truncf %44 : vector<8x8xf32> to vector<8x8xbf16>
      %cst_36 = arith.constant dense<0.000000e+00> : vector<8x8xf32>
      %55 = tpu.matmul %54, %17, %cst_36 {dimension_numbers = #tpu.dot_dimension_numbers<[1], [0], [0], [1], [0, 0, 1, 1], [], []>} : vector<8x8xbf16>, vector<8x8xbf16>, vector<8x8xf32> -> vector<8x8xf32>
      %56 = arith.addf %53, %55 : vector<8x8xf32>
      %c0_37 = arith.constant 0 : index
      %c0_38 = arith.constant 0 : index
      %57 = vector.load %arg11[%c0_37, %c0_38] : memref<8x8xf32, #tpu.memory_space<vmem>>, vector<8x8xf32>
      tpu.vector_store %arg11[%c0_37, %c0_38], %56 {strides = array<i32>} : memref<8x8xf32, #tpu.memory_space<vmem>>, vector<8x8xf32>,
      %c0_39 = arith.constant 0 : index
      %c0_40 = arith.constant 0 : index
      %58 = vector.load %arg9[%c0_39, %c0_40] : memref<8x1xf32, #tpu.memory_space<vmem>>, vector<8x1xf32>
      tpu.vector_store %arg9[%c0_39, %c0_40], %39 {strides = array<i32>} : memref<8x1xf32, #tpu.memory_space<vmem>>, vector<8x1xf32>,
    } else {
    }
    %c0_i32_3 = arith.constant 0 : i32
    %9 = arith.cmpi eq, %arg3, %c0_i32_3 : i32
    %10 = arith.extui %9 : i1 to i32
    %c0_i32_4 = arith.constant 0 : i32
    %11 = arith.cmpi ne, %10, %c0_i32_4 : i32
    scf.if %11 {
      %c0 = arith.constant 0 : index
      %c0_5 = arith.constant 0 : index
      %12 = vector.load %arg11[%c0, %c0_5] : memref<8x8xf32, #tpu.memory_space<vmem>>, vector<8x8xf32>
      %c0_6 = arith.constant 0 : index
      %c0_7 = arith.constant 0 : index
      %13 = vector.load %arg10[%c0_6, %c0_7] : memref<8x1xf32, #tpu.memory_space<vmem>>, vector<8x1xf32>
      %14 = tpu.reciprocal %13 {approx = true} : vector<8x1xf32> -> vector<8x1xf32>
      %15 = vector.broadcast %14 : vector<8x1xf32> to vector<8x8xf32>
      %16 = arith.mulf %12, %15 : vector<8x8xf32>
      %17 = arith.truncf %16 : vector<8x8xf32> to vector<8x8xbf16>
      %c0_8 = arith.constant 0 : index
      %c0_9 = arith.constant 0 : index
      %c0_10 = arith.constant 0 : index
      %c0_11 = arith.constant 0 : index
      %18 = vector.load %arg8[%c0_8, %c0_9, %c0_10, %c0_11] : memref<1x1x8x8xbf16, #tpu.memory_space<vmem>>, vector<1x1x8x8xbf16>
      %19 = vector.shape_cast %18 : vector<1x1x8x8xbf16> to vector<8x8xbf16>
      %20 = vector.shape_cast %17 : vector<8x8xbf16> to vector<1x1x8x8xbf16>
      tpu.vector_store %arg8[%c0_8, %c0_9, %c0_10, %c0_11], %20 {strides = array<i32>} : memref<1x1x8x8xbf16, #tpu.memory_space<vmem>>, vector<1x1x8x8xbf16>,
    } else {
    }
    return
  }
  func.func @transform_0(%arg0: i32, %arg1: i32, %arg2: i32, %arg3: i32) -> (i32, i32, i32, i32, i32) {
    %c0_i32 = arith.constant 0 : i32
    %c0_i32_0 = arith.constant 0 : i32
    %c0_i32_1 = arith.constant 0 : i32
    return %c0_i32, %arg0, %arg1, %arg2, %c0_i32_0 : i32, i32, i32, i32, i32
  }
  func.func @transform_1(%arg0: i32, %arg1: i32, %arg2: i32, %arg3: i32) -> (i32, i32, i32, i32, i32) {
    %c1_i32 = arith.constant 1 : i32
    %c0_i32 = arith.constant 0 : i32
    %c0_i32_0 = arith.constant 0 : i32
    return %c1_i32, %arg0, %arg1, %arg3, %c0_i32 : i32, i32, i32, i32, i32
  }
  func.func @transform_2(%arg0: i32, %arg1: i32, %arg2: i32, %arg3: i32) -> (i32, i32, i32, i32, i32) {
    %c2_i32 = arith.constant 2 : i32
    %c0_i32 = arith.constant 0 : i32
    %c0_i32_0 = arith.constant 0 : i32
    return %c2_i32, %arg0, %arg1, %arg3, %c0_i32 : i32, i32, i32, i32, i32
  }
  func.func @transform_3(%arg0: i32, %arg1: i32, %arg2: i32, %arg3: i32) -> (i32, i32, i32) {
    %c0_i32 = arith.constant 0 : i32
    %c0_i32_0 = arith.constant 0 : i32
    return %arg0, %arg2, %c0_i32 : i32, i32, i32
  }
  func.func @transform_4(%arg0: i32, %arg1: i32, %arg2: i32, %arg3: i32) -> (i32, i32, i32, i32) {
    %c0_i32 = arith.constant 0 : i32
    %c0_i32_0 = arith.constant 0 : i32
    return %arg0, %arg1, %arg2, %c0_i32 : i32, i32, i32, i32
  }
}

module attributes {stable_mosaic.version = 11 : i64} {
  func.func @_matmul_add_ln_kernel(%arg0: i32, %arg1: i32, %arg2: i32, %arg3: memref<16x32xbf16, #tpu.memory_space<vmem>>, %arg4: memref<32x32xbf16, #tpu.memory_space<vmem>>, %arg5: memref<1x32xf32, #tpu.memory_space<vmem>>, %arg6: memref<16x32xbf16, #tpu.memory_space<vmem>>, %arg7: memref<1x32xf32, #tpu.memory_space<vmem>>, %arg8: memref<1x32xf32, #tpu.memory_space<vmem>>, %arg9: memref<16x32xbf16, #tpu.memory_space<vmem>>, %arg10: memref<16x32xf32, #tpu.memory_space<vmem>>) attributes {dimension_semantics = [#tpu.dimension_semantics<parallel>, #tpu.dimension_semantics<parallel>, #tpu.dimension_semantics<arbitrary>], iteration_bounds = array<i64: 1, 1, 1>, scalar_prefetch = 0 : i64, scratch_operands = 1 : i64, tpu.core_type = #tpu.core_type<tc>, window_params = [{transform_indices = @transform_0, window_bounds = array<i64: 16, 32>}, {transform_indices = @transform_1, window_bounds = array<i64: 32, 32>}, {pipeline_mode = #tpu.pipeline_mode<synchronous>, transform_indices = @transform_2, window_bounds = array<i64: 1, 32>}, {transform_indices = @transform_3, window_bounds = array<i64: 16, 32>}, {pipeline_mode = #tpu.pipeline_mode<synchronous>, transform_indices = @transform_4, window_bounds = array<i64: 1, 32>}, {pipeline_mode = #tpu.pipeline_mode<synchronous>, transform_indices = @transform_5, window_bounds = array<i64: 1, 32>}, {transform_indices = @transform_6, window_bounds = array<i64: 16, 32>}]} {
    %c0_i32 = arith.constant 0 : i32
    %0 = arith.cmpi eq, %arg2, %c0_i32 : i32
    %1 = arith.extui %0 : i1 to i32
    %c0_i32_0 = arith.constant 0 : i32
    %2 = arith.cmpi ne, %1, %c0_i32_0 : i32
    scf.if %2 {
      %cst_10 = arith.constant 0.000000e+00 : f32
      %12 = vector.broadcast %cst_10 : f32 to vector<16x32xf32>
      %c0_11 = arith.constant 0 : index
      %c0_12 = arith.constant 0 : index
      %13 = vector.load %arg10[%c0_11, %c0_12] : memref<16x32xf32, #tpu.memory_space<vmem>>, vector<16x32xf32>
      tpu.vector_store %arg10[%c0_11, %c0_12], %12 {strides = array<i32>} : memref<16x32xf32, #tpu.memory_space<vmem>>, vector<16x32xf32>,
    } else {
    }
    %c0 = arith.constant 0 : index
    %c0_1 = arith.constant 0 : index
    %3 = vector.load %arg10[%c0, %c0_1] : memref<16x32xf32, #tpu.memory_space<vmem>>, vector<16x32xf32>
    %c0_2 = arith.constant 0 : index
    %c0_3 = arith.constant 0 : index
    %4 = vector.load %arg3[%c0_2, %c0_3] : memref<16x32xbf16, #tpu.memory_space<vmem>>, vector<16x32xbf16>
    %c0_4 = arith.constant 0 : index
    %c0_5 = arith.constant 0 : index
    %5 = vector.load %arg4[%c0_4, %c0_5] : memref<32x32xbf16, #tpu.memory_space<vmem>>, vector<32x32xbf16>
    %cst = arith.constant dense<0.000000e+00> : vector<16x32xf32>
    %6 = tpu.matmul %4, %5, %cst {dimension_numbers = #tpu.dot_dimension_numbers<[1], [0], [0], [1], [0, 0, 1, 1], [], []>} : vector<16x32xbf16>, vector<32x32xbf16>, vector<16x32xf32> -> vector<16x32xf32>
    %7 = arith.addf %3, %6 : vector<16x32xf32>
    %c0_6 = arith.constant 0 : index
    %c0_7 = arith.constant 0 : index
    %8 = vector.load %arg10[%c0_6, %c0_7] : memref<16x32xf32, #tpu.memory_space<vmem>>, vector<16x32xf32>
    tpu.vector_store %arg10[%c0_6, %c0_7], %7 {strides = array<i32>} : memref<16x32xf32, #tpu.memory_space<vmem>>, vector<16x32xf32>,
    %c0_i32_8 = arith.constant 0 : i32
    %9 = arith.cmpi eq, %arg2, %c0_i32_8 : i32
    %10 = arith.extui %9 : i1 to i32
    %c0_i32_9 = arith.constant 0 : i32
    %11 = arith.cmpi ne, %10, %c0_i32_9 : i32
    scf.if %11 {
      %c0_10 = arith.constant 0 : index
      %c0_11 = arith.constant 0 : index
      %12 = vector.load %arg10[%c0_10, %c0_11] : memref<16x32xf32, #tpu.memory_space<vmem>>, vector<16x32xf32>
      %c0_12 = arith.constant 0 : index
      %c0_13 = arith.constant 0 : index
      %13 = vector.load %arg5[%c0_12, %c0_13] : memref<1x32xf32, #tpu.memory_space<vmem>>, vector<1x32xf32>
      %14 = vector.broadcast %13 : vector<1x32xf32> to vector<16x32xf32>
      %15 = arith.addf %12, %14 : vector<16x32xf32>
      %c0_14 = arith.constant 0 : index
      %c0_15 = arith.constant 0 : index
      %16 = vector.load %arg6[%c0_14, %c0_15] : memref<16x32xbf16, #tpu.memory_space<vmem>>, vector<16x32xbf16>
      %17 = arith.extf %16 : vector<16x32xbf16> to vector<16x32xf32>
      %18 = arith.addf %15, %17 : vector<16x32xf32>
      %cst_16 = arith.constant dense<0.000000e+00> : vector<16xf32>
      %19 = vector.multi_reduction <add>, %18, %cst_16 [1] : vector<16x32xf32> to vector<16xf32>
      %20 = vector.shape_cast %19 : vector<16xf32> to vector<16x1xf32>
      %cst_17 = arith.constant 3.200000e+01 : f32
      %21 = vector.broadcast %cst_17 : f32 to vector<16x1xf32>
      %22 = arith.divf %20, %21 : vector<16x1xf32>
      %23 = vector.broadcast %22 : vector<16x1xf32> to vector<16x32xf32>
      %24 = arith.subf %18, %23 : vector<16x32xf32>
      %25 = vector.broadcast %22 : vector<16x1xf32> to vector<16x32xf32>
      %26 = arith.subf %18, %25 : vector<16x32xf32>
      %27 = arith.mulf %24, %26 : vector<16x32xf32>
      %cst_18 = arith.constant dense<0.000000e+00> : vector<16xf32>
      %28 = vector.multi_reduction <add>, %27, %cst_18 [1] : vector<16x32xf32> to vector<16xf32>
      %29 = vector.shape_cast %28 : vector<16xf32> to vector<16x1xf32>
      %cst_19 = arith.constant 3.200000e+01 : f32
      %30 = vector.broadcast %cst_19 : f32 to vector<16x1xf32>
      %31 = arith.divf %29, %30 : vector<16x1xf32>
      %32 = vector.broadcast %22 : vector<16x1xf32> to vector<16x32xf32>
      %33 = arith.subf %18, %32 : vector<16x32xf32>
      %cst_20 = arith.constant 9.99999974E-6 : f32
      %34 = vector.broadcast %cst_20 : f32 to vector<16x1xf32>
      %35 = arith.addf %31, %34 : vector<16x1xf32>
      %36 = math.rsqrt %35 : vector<16x1xf32>
      %37 = vector.broadcast %36 : vector<16x1xf32> to vector<16x32xf32>
      %38 = arith.mulf %33, %37 : vector<16x32xf32>
      %c0_21 = arith.constant 0 : index
      %c0_22 = arith.constant 0 : index
      %39 = vector.load %arg7[%c0_21, %c0_22] : memref<1x32xf32, #tpu.memory_space<vmem>>, vector<1x32xf32>
      %40 = vector.broadcast %39 : vector<1x32xf32> to vector<16x32xf32>
      %41 = arith.mulf %38, %40 : vector<16x32xf32>
      %c0_23 = arith.constant 0 : index
      %c0_24 = arith.constant 0 : index
      %42 = vector.load %arg8[%c0_23, %c0_24] : memref<1x32xf32, #tpu.memory_space<vmem>>, vector<1x32xf32>
      %43 = vector.broadcast %42 : vector<1x32xf32> to vector<16x32xf32>
      %44 = arith.addf %41, %43 : vector<16x32xf32>
      %45 = arith.truncf %44 : vector<16x32xf32> to vector<16x32xbf16>
      %c0_25 = arith.constant 0 : index
      %c0_26 = arith.constant 0 : index
      %46 = vector.load %arg9[%c0_25, %c0_26] : memref<16x32xbf16, #tpu.memory_space<vmem>>, vector<16x32xbf16>
      tpu.vector_store %arg9[%c0_25, %c0_26], %45 {strides = array<i32>} : memref<16x32xbf16, #tpu.memory_space<vmem>>, vector<16x32xbf16>,
    } else {
    }
    return
  }
  func.func @transform_0(%arg0: i32, %arg1: i32, %arg2: i32) -> (i32, i32) {
    %c0_i32 = arith.constant 0 : i32
    return %arg0, %arg2 : i32, i32
  }
  func.func @transform_1(%arg0: i32, %arg1: i32, %arg2: i32) -> (i32, i32) {
    %c0_i32 = arith.constant 0 : i32
    %c0_i32_0 = arith.constant 0 : i32
    return %arg2, %c0_i32 : i32, i32
  }
  func.func @transform_2(%arg0: i32, %arg1: i32, %arg2: i32) -> (i32, i32) {
    %c0_i32 = arith.constant 0 : i32
    %c0_i32_0 = arith.constant 0 : i32
    %c0_i32_1 = arith.constant 0 : i32
    return %c0_i32, %c0_i32_0 : i32, i32
  }
  func.func @transform_3(%arg0: i32, %arg1: i32, %arg2: i32) -> (i32, i32) {
    %c0_i32 = arith.constant 0 : i32
    %c0_i32_0 = arith.constant 0 : i32
    return %arg0, %c0_i32 : i32, i32
  }
  func.func @transform_4(%arg0: i32, %arg1: i32, %arg2: i32) -> (i32, i32) {
    %c0_i32 = arith.constant 0 : i32
    %c0_i32_0 = arith.constant 0 : i32
    %c0_i32_1 = arith.constant 0 : i32
    return %c0_i32, %c0_i32_0 : i32, i32
  }
  func.func @transform_5(%arg0: i32, %arg1: i32, %arg2: i32) -> (i32, i32) {
    %c0_i32 = arith.constant 0 : i32
    %c0_i32_0 = arith.constant 0 : i32
    %c0_i32_1 = arith.constant 0 : i32
    return %c0_i32, %c0_i32_0 : i32, i32
  }
  func.func @transform_6(%arg0: i32, %arg1: i32, %arg2: i32) -> (i32, i32) {
    %c0_i32 = arith.constant 0 : i32
    %c0_i32_0 = arith.constant 0 : i32
    return %arg0, %c0_i32 : i32, i32
  }
}

module attributes {stable_mosaic.version = 11 : i64} {
  func.func @_matmul_kernel(%arg0: i32, %arg1: i32, %arg2: i32, %arg3: memref<16x32xbf16, #tpu.memory_space<vmem>>, %arg4: memref<32x32xbf16, #tpu.memory_space<vmem>>, %arg5: memref<1x32xf32, #tpu.memory_space<vmem>>, %arg6: memref<16x32xbf16, #tpu.memory_space<vmem>>, %arg7: memref<16x32xf32, #tpu.memory_space<vmem>>) attributes {dimension_semantics = [#tpu.dimension_semantics<parallel>, #tpu.dimension_semantics<parallel>, #tpu.dimension_semantics<arbitrary>], iteration_bounds = array<i64: 1, 1, 1>, scalar_prefetch = 0 : i64, scratch_operands = 1 : i64, tpu.core_type = #tpu.core_type<tc>, window_params = [{transform_indices = @transform_0, window_bounds = array<i64: 16, 32>}, {transform_indices = @transform_1, window_bounds = array<i64: 32, 32>}, {transform_indices = @transform_2, window_bounds = array<i64: 1, 32>}, {transform_indices = @transform_3, window_bounds = array<i64: 16, 32>}]} {
    %c0_i32 = arith.constant 0 : i32
    %0 = arith.cmpi eq, %arg2, %c0_i32 : i32
    %1 = arith.extui %0 : i1 to i32
    %c0_i32_0 = arith.constant 0 : i32
    %2 = arith.cmpi ne, %1, %c0_i32_0 : i32
    scf.if %2 {
      %cst_10 = arith.constant 0.000000e+00 : f32
      %12 = vector.broadcast %cst_10 : f32 to vector<16x32xf32>
      %c0_11 = arith.constant 0 : index
      %c0_12 = arith.constant 0 : index
      %13 = vector.load %arg7[%c0_11, %c0_12] : memref<16x32xf32, #tpu.memory_space<vmem>>, vector<16x32xf32>
      tpu.vector_store %arg7[%c0_11, %c0_12], %12 {strides = array<i32>} : memref<16x32xf32, #tpu.memory_space<vmem>>, vector<16x32xf32>,
    } else {
    }
    %c0 = arith.constant 0 : index
    %c0_1 = arith.constant 0 : index
    %3 = vector.load %arg7[%c0, %c0_1] : memref<16x32xf32, #tpu.memory_space<vmem>>, vector<16x32xf32>
    %c0_2 = arith.constant 0 : index
    %c0_3 = arith.constant 0 : index
    %4 = vector.load %arg3[%c0_2, %c0_3] : memref<16x32xbf16, #tpu.memory_space<vmem>>, vector<16x32xbf16>
    %c0_4 = arith.constant 0 : index
    %c0_5 = arith.constant 0 : index
    %5 = vector.load %arg4[%c0_4, %c0_5] : memref<32x32xbf16, #tpu.memory_space<vmem>>, vector<32x32xbf16>
    %cst = arith.constant dense<0.000000e+00> : vector<16x32xf32>
    %6 = tpu.matmul %4, %5, %cst {dimension_numbers = #tpu.dot_dimension_numbers<[1], [0], [0], [1], [0, 0, 1, 1], [], []>} : vector<16x32xbf16>, vector<32x32xbf16>, vector<16x32xf32> -> vector<16x32xf32>
    %7 = arith.addf %3, %6 : vector<16x32xf32>
    %c0_6 = arith.constant 0 : index
    %c0_7 = arith.constant 0 : index
    %8 = vector.load %arg7[%c0_6, %c0_7] : memref<16x32xf32, #tpu.memory_space<vmem>>, vector<16x32xf32>
    tpu.vector_store %arg7[%c0_6, %c0_7], %7 {strides = array<i32>} : memref<16x32xf32, #tpu.memory_space<vmem>>, vector<16x32xf32>,
    %c0_i32_8 = arith.constant 0 : i32
    %9 = arith.cmpi eq, %arg2, %c0_i32_8 : i32
    %10 = arith.extui %9 : i1 to i32
    %c0_i32_9 = arith.constant 0 : i32
    %11 = arith.cmpi ne, %10, %c0_i32_9 : i32
    scf.if %11 {
      %c0_10 = arith.constant 0 : index
      %c0_11 = arith.constant 0 : index
      %12 = vector.load %arg7[%c0_10, %c0_11] : memref<16x32xf32, #tpu.memory_space<vmem>>, vector<16x32xf32>
      %c0_12 = arith.constant 0 : index
      %c0_13 = arith.constant 0 : index
      %13 = vector.load %arg5[%c0_12, %c0_13] : memref<1x32xf32, #tpu.memory_space<vmem>>, vector<1x32xf32>
      %14 = vector.broadcast %13 : vector<1x32xf32> to vector<16x32xf32>
      %15 = arith.addf %12, %14 : vector<16x32xf32>
      %16 = arith.truncf %15 : vector<16x32xf32> to vector<16x32xbf16>
      %c0_14 = arith.constant 0 : index
      %c0_15 = arith.constant 0 : index
      %17 = vector.load %arg6[%c0_14, %c0_15] : memref<16x32xbf16, #tpu.memory_space<vmem>>, vector<16x32xbf16>
      tpu.vector_store %arg6[%c0_14, %c0_15], %16 {strides = array<i32>} : memref<16x32xbf16, #tpu.memory_space<vmem>>, vector<16x32xbf16>,
    } else {
    }
    return
  }
  func.func @transform_0(%arg0: i32, %arg1: i32, %arg2: i32) -> (i32, i32) {
    %c0_i32 = arith.constant 0 : i32
    return %arg0, %arg2 : i32, i32
  }
  func.func @transform_1(%arg0: i32, %arg1: i32, %arg2: i32) -> (i32, i32) {
    %c0_i32 = arith.constant 0 : i32
    return %arg2, %arg1 : i32, i32
  }
  func.func @transform_2(%arg0: i32, %arg1: i32, %arg2: i32) -> (i32, i32) {
    %c0_i32 = arith.constant 0 : i32
    %c0_i32_0 = arith.constant 0 : i32
    return %c0_i32, %arg1 : i32, i32
  }
  func.func @transform_3(%arg0: i32, %arg1: i32, %arg2: i32) -> (i32, i32) {
    %c0_i32 = arith.constant 0 : i32
    return %arg0, %arg1 : i32, i32
  }
}

module attributes {stable_mosaic.version = 11 : i64} {
  func.func @_matmul_kernel(%arg0: i32, %arg1: i32, %arg2: i32, %arg3: memref<16x32xbf16, #tpu.memory_space<vmem>>, %arg4: memref<32x64xbf16, #tpu.memory_space<vmem>>, %arg5: memref<1x64xf32, #tpu.memory_space<vmem>>, %arg6: memref<16x64xbf16, #tpu.memory_space<vmem>>, %arg7: memref<16x64xf32, #tpu.memory_space<vmem>>) attributes {dimension_semantics = [#tpu.dimension_semantics<parallel>, #tpu.dimension_semantics<parallel>, #tpu.dimension_semantics<arbitrary>], iteration_bounds = array<i64: 1, 1, 1>, scalar_prefetch = 0 : i64, scratch_operands = 1 : i64, tpu.core_type = #tpu.core_type<tc>, window_params = [{transform_indices = @transform_0, window_bounds = array<i64: 16, 32>}, {transform_indices = @transform_1, window_bounds = array<i64: 32, 64>}, {transform_indices = @transform_2, window_bounds = array<i64: 1, 64>}, {transform_indices = @transform_3, window_bounds = array<i64: 16, 64>}]} {
    %c0_i32 = arith.constant 0 : i32
    %0 = arith.cmpi eq, %arg2, %c0_i32 : i32
    %1 = arith.extui %0 : i1 to i32
    %c0_i32_0 = arith.constant 0 : i32
    %2 = arith.cmpi ne, %1, %c0_i32_0 : i32
    scf.if %2 {
      %cst_10 = arith.constant 0.000000e+00 : f32
      %12 = vector.broadcast %cst_10 : f32 to vector<16x64xf32>
      %c0_11 = arith.constant 0 : index
      %c0_12 = arith.constant 0 : index
      %13 = vector.load %arg7[%c0_11, %c0_12] : memref<16x64xf32, #tpu.memory_space<vmem>>, vector<16x64xf32>
      tpu.vector_store %arg7[%c0_11, %c0_12], %12 {strides = array<i32>} : memref<16x64xf32, #tpu.memory_space<vmem>>, vector<16x64xf32>,
    } else {
    }
    %c0 = arith.constant 0 : index
    %c0_1 = arith.constant 0 : index
    %3 = vector.load %arg7[%c0, %c0_1] : memref<16x64xf32, #tpu.memory_space<vmem>>, vector<16x64xf32>
    %c0_2 = arith.constant 0 : index
    %c0_3 = arith.constant 0 : index
    %4 = vector.load %arg3[%c0_2, %c0_3] : memref<16x32xbf16, #tpu.memory_space<vmem>>, vector<16x32xbf16>
    %c0_4 = arith.constant 0 : index
    %c0_5 = arith.constant 0 : index
    %5 = vector.load %arg4[%c0_4, %c0_5] : memref<32x64xbf16, #tpu.memory_space<vmem>>, vector<32x64xbf16>
    %cst = arith.constant dense<0.000000e+00> : vector<16x64xf32>
    %6 = tpu.matmul %4, %5, %cst {dimension_numbers = #tpu.dot_dimension_numbers<[1], [0], [0], [1], [0, 0, 1, 1], [], []>} : vector<16x32xbf16>, vector<32x64xbf16>, vector<16x64xf32> -> vector<16x64xf32>
    %7 = arith.addf %3, %6 : vector<16x64xf32>
    %c0_6 = arith.constant 0 : index
    %c0_7 = arith.constant 0 : index
    %8 = vector.load %arg7[%c0_6, %c0_7] : memref<16x64xf32, #tpu.memory_space<vmem>>, vector<16x64xf32>
    tpu.vector_store %arg7[%c0_6, %c0_7], %7 {strides = array<i32>} : memref<16x64xf32, #tpu.memory_space<vmem>>, vector<16x64xf32>,
    %c0_i32_8 = arith.constant 0 : i32
    %9 = arith.cmpi eq, %arg2, %c0_i32_8 : i32
    %10 = arith.extui %9 : i1 to i32
    %c0_i32_9 = arith.constant 0 : i32
    %11 = arith.cmpi ne, %10, %c0_i32_9 : i32
    scf.if %11 {
      %c0_10 = arith.constant 0 : index
      %c0_11 = arith.constant 0 : index
      %12 = vector.load %arg7[%c0_10, %c0_11] : memref<16x64xf32, #tpu.memory_space<vmem>>, vector<16x64xf32>
      %c0_12 = arith.constant 0 : index
      %c0_13 = arith.constant 0 : index
      %13 = vector.load %arg5[%c0_12, %c0_13] : memref<1x64xf32, #tpu.memory_space<vmem>>, vector<1x64xf32>
      %14 = vector.broadcast %13 : vector<1x64xf32> to vector<16x64xf32>
      %15 = arith.addf %12, %14 : vector<16x64xf32>
      %cst_14 = arith.constant 0.000000e+00 : f32
      %16 = vector.broadcast %cst_14 : f32 to vector<16x64xf32>
      %17 = arith.maximumf %15, %16 : vector<16x64xf32>
      %18 = arith.truncf %17 : vector<16x64xf32> to vector<16x64xbf16>
      %c0_15 = arith.constant 0 : index
      %c0_16 = arith.constant 0 : index
      %19 = vector.load %arg6[%c0_15, %c0_16] : memref<16x64xbf16, #tpu.memory_space<vmem>>, vector<16x64xbf16>
      tpu.vector_store %arg6[%c0_15, %c0_16], %18 {strides = array<i32>} : memref<16x64xbf16, #tpu.memory_space<vmem>>, vector<16x64xbf16>,
    } else {
    }
    return
  }
  func.func @transform_0(%arg0: i32, %arg1: i32, %arg2: i32) -> (i32, i32) {
    %c0_i32 = arith.constant 0 : i32
    return %arg0, %arg2 : i32, i32
  }
  func.func @transform_1(%arg0: i32, %arg1: i32, %arg2: i32) -> (i32, i32) {
    %c0_i32 = arith.constant 0 : i32
    return %arg2, %arg1 : i32, i32
  }
  func.func @transform_2(%arg0: i32, %arg1: i32, %arg2: i32) -> (i32, i32) {
    %c0_i32 = arith.constant 0 : i32
    %c0_i32_0 = arith.constant 0 : i32
    return %c0_i32, %arg1 : i32, i32
  }
  func.func @transform_3(%arg0: i32, %arg1: i32, %arg2: i32) -> (i32, i32) {
    %c0_i32 = arith.constant 0 : i32
    return %arg0, %arg1 : i32, i32
  }
}

module attributes {stable_mosaic.version = 11 : i64} {
  func.func @_flash_attn_kernel(%arg0: i32, %arg1: i32, %arg2: i32, %arg3: i32, %arg4: memref<1x1x1x8x8xbf16, #tpu.memory_space<vmem>>, %arg5: memref<1x1x1x8x8xbf16, #tpu.memory_space<vmem>>, %arg6: memref<1x1x1x8x8xbf16, #tpu.memory_space<vmem>>, %arg7: memref<1x1x8xf32, #tpu.memory_space<vmem>>, %arg8: memref<1x1x8x8xbf16, #tpu.memory_space<vmem>>, %arg9: memref<8x1xf32, #tpu.memory_space<vmem>>, %arg10: memref<8x1xf32, #tpu.memory_space<vmem>>, %arg11: memref<8x8xf32, #tpu.memory_space<vmem>>) attributes {dimension_semantics = [#tpu.dimension_semantics<parallel>, #tpu.dimension_semantics<parallel>, #tpu.dimension_semantics<parallel>, #tpu.dimension_semantics<arbitrary>], iteration_bounds = array<i64: 2, 4, 1, 1>, scalar_prefetch = 0 : i64, scratch_operands = 3 : i64, tpu.core_type = #tpu.core_type<tc>, window_params = [{transform_indices = @transform_0, window_bounds = array<i64: 1, 1, 1, 8, 8>}, {transform_indices = @transform_1, window_bounds = array<i64: 1, 1, 1, 8, 8>}, {transform_indices = @transform_2, window_bounds = array<i64: 1, 1, 1, 8, 8>}, {transform_indices = @transform_3, window_bounds = array<i64: 1, 1, 8>}, {transform_indices = @transform_4, window_bounds = array<i64: 1, 1, 8, 8>}]} {
    %c0_i32 = arith.constant 0 : i32
    %0 = arith.cmpi eq, %arg3, %c0_i32 : i32
    %1 = arith.extui %0 : i1 to i32
    %c0_i32_0 = arith.constant 0 : i32
    %2 = arith.cmpi ne, %1, %c0_i32_0 : i32
    scf.if %2 {
      %cst_37 = arith.constant -1.000000e+30 : f32
      %44 = vector.broadcast %cst_37 : f32 to vector<8x1xf32>
      %c0_38 = arith.constant 0 : index
      %c0_39 = arith.constant 0 : index
      %45 = vector.load %arg9[%c0_38, %c0_39] : memref<8x1xf32, #tpu.memory_space<vmem>>, vector<8x1xf32>
      tpu.vector_store %arg9[%c0_38, %c0_39], %44 {strides = array<i32>} : memref<8x1xf32, #tpu.memory_space<vmem>>, vector<8x1xf32>,
      %cst_40 = arith.constant 0.000000e+00 : f32
      %46 = vector.broadcast %cst_40 : f32 to vector<8x1xf32>
      %c0_41 = arith.constant 0 : index
      %c0_42 = arith.constant 0 : index
      %47 = vector.load %arg10[%c0_41, %c0_42] : memref<8x1xf32, #tpu.memory_space<vmem>>, vector<8x1xf32>
      tpu.vector_store %arg10[%c0_41, %c0_42], %46 {strides = array<i32>} : memref<8x1xf32, #tpu.memory_space<vmem>>, vector<8x1xf32>,
      %cst_43 = arith.constant 0.000000e+00 : f32
      %48 = vector.broadcast %cst_43 : f32 to vector<8x8xf32>
      %c0_44 = arith.constant 0 : index
      %c0_45 = arith.constant 0 : index
      %49 = vector.load %arg11[%c0_44, %c0_45] : memref<8x8xf32, #tpu.memory_space<vmem>>, vector<8x8xf32>
      tpu.vector_store %arg11[%c0_44, %c0_45], %48 {strides = array<i32>} : memref<8x8xf32, #tpu.memory_space<vmem>>, vector<8x8xf32>,
    } else {
    }
    %c0 = arith.constant 0 : index
    %c0_1 = arith.constant 0 : index
    %c0_2 = arith.constant 0 : index
    %c0_3 = arith.constant 0 : index
    %c0_4 = arith.constant 0 : index
    %3 = vector.load %arg4[%c0, %c0_1, %c0_2, %c0_3, %c0_4] : memref<1x1x1x8x8xbf16, #tpu.memory_space<vmem>>, vector<1x1x1x8x8xbf16>
    %4 = vector.shape_cast %3 : vector<1x1x1x8x8xbf16> to vector<8x8xbf16>
    %c0_5 = arith.constant 0 : index
    %c0_6 = arith.constant 0 : index
    %c0_7 = arith.constant 0 : index
    %c0_8 = arith.constant 0 : index
    %c0_9 = arith.constant 0 : index
    %5 = vector.load %arg5[%c0_5, %c0_6, %c0_7, %c0_8, %c0_9] : memref<1x1x1x8x8xbf16, #tpu.memory_space<vmem>>, vector<1x1x1x8x8xbf16>
    %6 = vector.shape_cast %5 : vector<1x1x1x8x8xbf16> to vector<8x8xbf16>
    %c0_10 = arith.constant 0 : index
    %c0_11 = arith.constant 0 : index
    %c0_12 = arith.constant 0 : index
    %c0_13 = arith.constant 0 : index
    %c0_14 = arith.constant 0 : index
    %7 = vector.load %arg6[%c0_10, %c0_11, %c0_12, %c0_13, %c0_14] : memref<1x1x1x8x8xbf16, #tpu.memory_space<vmem>>, vector<1x1x1x8x8xbf16>
    %8 = vector.shape_cast %7 : vector<1x1x1x8x8xbf16> to vector<8x8xbf16>
    %cst = arith.constant dense<0.000000e+00> : vector<8x8xf32>
    %9 = tpu.matmul %4, %6, %cst {dimension_numbers = #tpu.dot_dimension_numbers<[1], [1], [0], [0], [0, 0, 1, 0], [], []>} : vector<8x8xbf16>, vector<8x8xbf16>, vector<8x8xf32> -> vector<8x8xf32>
    %c0_15 = arith.constant 0 : index
    %c0_16 = arith.constant 0 : index
    %c0_17 = arith.constant 0 : index
    %10 = vector.load %arg7[%c0_15, %c0_16, %c0_17] : memref<1x1x8xf32, #tpu.memory_space<vmem>>, vector<1x1x8xf32>
    %11 = vector.shape_cast %10 : vector<1x1x8xf32> to vector<1x8xf32>
    %cst_18 = arith.constant 5.000000e-01 : f32
    %12 = vector.broadcast %cst_18 : f32 to vector<1x8xf32>
    %13 = arith.cmpf ogt, %11, %12 : vector<1x8xf32>
    %cst_19 = arith.constant -1.000000e+09 : f32
    %14 = vector.shape_cast %13 : vector<1x8xi1> to vector<1x8xi1>
    %15 = vector.broadcast %14 : vector<1x8xi1> to vector<8x8xi1>
    %16 = vector.broadcast %cst_19 : f32 to vector<8x8xf32>
    %17 = arith.select %15, %9, %16 : vector<8x8xi1>, vector<8x8xf32>
    %c0_20 = arith.constant 0 : index
    %c0_21 = arith.constant 0 : index
    %18 = vector.load %arg9[%c0_20, %c0_21] : memref<8x1xf32, #tpu.memory_space<vmem>>, vector<8x1xf32>
    %cst_22 = arith.constant dense<0xFF800000> : vector<8xf32>
    %19 = vector.multi_reduction <maximumf>, %17, %cst_22 [1] : vector<8x8xf32> to vector<8xf32>
    %20 = vector.shape_cast %19 : vector<8xf32> to vector<8x1xf32>
    %21 = arith.maximumf %18, %20 : vector<8x1xf32>
    %22 = arith.subf %18, %21 : vector<8x1xf32>
    %23 = math.exp %22 : vector<8x1xf32>
    %24 = vector.broadcast %21 : vector<8x1xf32> to vector<8x8xf32>
    %25 = arith.subf %17, %24 : vector<8x8xf32>
    %26 = math.exp %25 : vector<8x8xf32>
    %c0_23 = arith.constant 0 : index
    %c0_24 = arith.constant 0 : index
    %27 = vector.load %arg10[%c0_23, %c0_24] : memref<8x1xf32, #tpu.memory_space<vmem>>, vector<8x1xf32>
    %28 = arith.mulf %23, %27 : vector<8x1xf32>
    %cst_25 = arith.constant dense<0.000000e+00> : vector<8xf32>
    %29 = vector.multi_reduction <add>, %26, %cst_25 [1] : vector<8x8xf32> to vector<8xf32>
    %30 = vector.shape_cast %29 : vector<8xf32> to vector<8x1xf32>
    %31 = arith.addf %28, %30 : vector<8x1xf32>
    %c0_26 = arith.constant 0 : index
    %c0_27 = arith.constant 0 : index
    %32 = vector.load %arg10[%c0_26, %c0_27] : memref<8x1xf32, #tpu.memory_space<vmem>>, vector<8x1xf32>
    tpu.vector_store %arg10[%c0_26, %c0_27], %31 {strides = array<i32>} : memref<8x1xf32, #tpu.memory_space<vmem>>, vector<8x1xf32>,
    %c0_28 = arith.constant 0 : index
    %c0_29 = arith.constant 0 : index
    %33 = vector.load %arg11[%c0_28, %c0_29] : memref<8x8xf32, #tpu.memory_space<vmem>>, vector<8x8xf32>
    %34 = vector.broadcast %23 : vector<8x1xf32> to vector<8x8xf32>
    %35 = arith.mulf %34, %33 : vector<8x8xf32>
    %36 = arith.truncf %26 : vector<8x8xf32> to vector<8x8xbf16>
    %cst_30 = arith.constant dense<0.000000e+00> : vector<8x8xf32>
    %37 = tpu.matmul %36, %8, %cst_30 {dimension_numbers = #tpu.dot_dimension_numbers<[1], [0], [0], [1], [0, 0, 1, 1], [], []>} : vector<8x8xbf16>, vector<8x8xbf16>, vector<8x8xf32> -> vector<8x8xf32>
    %38 = arith.addf %35, %37 : vector<8x8xf32>
    %c0_31 = arith.constant 0 : index
    %c0_32 = arith.constant 0 : index
    %39 = vector.load %arg11[%c0_31, %c0_32] : memref<8x8xf32, #tpu.memory_space<vmem>>, vector<8x8xf32>
    tpu.vector_store %arg11[%c0_31, %c0_32], %38 {strides = array<i32>} : memref<8x8xf32, #tpu.memory_space<vmem>>, vector<8x8xf32>,
    %c0_33 = arith.constant 0 : index
    %c0_34 = arith.constant 0 : index
    %40 = vector.load %arg9[%c0_33, %c0_34] : memref<8x1xf32, #tpu.memory_space<vmem>>, vector<8x1xf32>
    tpu.vector_store %arg9[%c0_33, %c0_34], %21 {strides = array<i32>} : memref<8x1xf32, #tpu.memory_space<vmem>>, vector<8x1xf32>,
    %c0_i32_35 = arith.constant 0 : i32
    %41 = arith.cmpi eq, %arg3, %c0_i32_35 : i32
    %42 = arith.extui %41 : i1 to i32
    %c0_i32_36 = arith.constant 0 : i32
    %43 = arith.cmpi ne, %42, %c0_i32_36 : i32
    scf.if %43 {
      %c0_37 = arith.constant 0 : index
      %c0_38 = arith.constant 0 : index
      %44 = vector.load %arg11[%c0_37, %c0_38] : memref<8x8xf32, #tpu.memory_space<vmem>>, vector<8x8xf32>
      %c0_39 = arith.constant 0 : index
      %c0_40 = arith.constant 0 : index
      %45 = vector.load %arg10[%c0_39, %c0_40] : memref<8x1xf32, #tpu.memory_space<vmem>>, vector<8x1xf32>
      %46 = tpu.reciprocal %45 {approx = true} : vector<8x1xf32> -> vector<8x1xf32>
      %47 = vector.broadcast %46 : vector<8x1xf32> to vector<8x8xf32>
      %48 = arith.mulf %44, %47 : vector<8x8xf32>
      %49 = arith.truncf %48 : vector<8x8xf32> to vector<8x8xbf16>
      %c0_41 = arith.constant 0 : index
      %c0_42 = arith.constant 0 : index
      %c0_43 = arith.constant 0 : index
      %c0_44 = arith.constant 0 : index
      %50 = vector.load %arg8[%c0_41, %c0_42, %c0_43, %c0_44] : memref<1x1x8x8xbf16, #tpu.memory_space<vmem>>, vector<1x1x8x8xbf16>
      %51 = vector.shape_cast %50 : vector<1x1x8x8xbf16> to vector<8x8xbf16>
      %52 = vector.shape_cast %49 : vector<8x8xbf16> to vector<1x1x8x8xbf16>
      tpu.vector_store %arg8[%c0_41, %c0_42, %c0_43, %c0_44], %52 {strides = array<i32>} : memref<1x1x8x8xbf16, #tpu.memory_space<vmem>>, vector<1x1x8x8xbf16>,
    } else {
    }
    return
  }
  func.func @transform_0(%arg0: i32, %arg1: i32, %arg2: i32, %arg3: i32) -> (i32, i32, i32, i32, i32) {
    %c0_i32 = arith.constant 0 : i32
    %c0_i32_0 = arith.constant 0 : i32
    %c0_i32_1 = arith.constant 0 : i32
    return %c0_i32, %arg0, %arg1, %arg2, %c0_i32_0 : i32, i32, i32, i32, i32
  }
  func.func @transform_1(%arg0: i32, %arg1: i32, %arg2: i32, %arg3: i32) -> (i32, i32, i32, i32, i32) {
    %c1_i32 = arith.constant 1 : i32
    %c0_i32 = arith.constant 0 : i32
    %c0_i32_0 = arith.constant 0 : i32
    return %c1_i32, %arg0, %arg1, %arg3, %c0_i32 : i32, i32, i32, i32, i32
  }
  func.func @transform_2(%arg0: i32, %arg1: i32, %arg2: i32, %arg3: i32) -> (i32, i32, i32, i32, i32) {
    %c2_i32 = arith.constant 2 : i32
    %c0_i32 = arith.constant 0 : i32
    %c0_i32_0 = arith.constant 0 : i32
    return %c2_i32, %arg0, %arg1, %arg3, %c0_i32 : i32, i32, i32, i32, i32
  }
  func.func @transform_3(%arg0: i32, %arg1: i32, %arg2: i32, %arg3: i32) -> (i32, i32, i32) {
    %c0_i32 = arith.constant 0 : i32
    %c0_i32_0 = arith.constant 0 : i32
    return %arg0, %c0_i32, %arg3 : i32, i32, i32
  }
  func.func @transform_4(%arg0: i32, %arg1: i32, %arg2: i32, %arg3: i32) -> (i32, i32, i32, i32) {
    %c0_i32 = arith.constant 0 : i32
    %c0_i32_0 = arith.constant 0 : i32
    return %arg0, %arg1, %arg2, %c0_i32 : i32, i32, i32, i32
  }
}

module attributes {stable_mosaic.version = 11 : i64} {
  func.func @_matmul_add_ln_kernel(%arg0: i32, %arg1: i32, %arg2: i32, %arg3: memref<16x64xbf16, #tpu.memory_space<vmem>>, %arg4: memref<64x32xbf16, #tpu.memory_space<vmem>>, %arg5: memref<1x32xf32, #tpu.memory_space<vmem>>, %arg6: memref<16x32xbf16, #tpu.memory_space<vmem>>, %arg7: memref<1x32xf32, #tpu.memory_space<vmem>>, %arg8: memref<1x32xf32, #tpu.memory_space<vmem>>, %arg9: memref<16x32xbf16, #tpu.memory_space<vmem>>, %arg10: memref<16x32xf32, #tpu.memory_space<vmem>>) attributes {dimension_semantics = [#tpu.dimension_semantics<parallel>, #tpu.dimension_semantics<parallel>, #tpu.dimension_semantics<arbitrary>], iteration_bounds = array<i64: 1, 1, 1>, scalar_prefetch = 0 : i64, scratch_operands = 1 : i64, tpu.core_type = #tpu.core_type<tc>, window_params = [{transform_indices = @transform_0, window_bounds = array<i64: 16, 64>}, {transform_indices = @transform_1, window_bounds = array<i64: 64, 32>}, {pipeline_mode = #tpu.pipeline_mode<synchronous>, transform_indices = @transform_2, window_bounds = array<i64: 1, 32>}, {transform_indices = @transform_3, window_bounds = array<i64: 16, 32>}, {pipeline_mode = #tpu.pipeline_mode<synchronous>, transform_indices = @transform_4, window_bounds = array<i64: 1, 32>}, {pipeline_mode = #tpu.pipeline_mode<synchronous>, transform_indices = @transform_5, window_bounds = array<i64: 1, 32>}, {transform_indices = @transform_6, window_bounds = array<i64: 16, 32>}]} {
    %c0_i32 = arith.constant 0 : i32
    %0 = arith.cmpi eq, %arg2, %c0_i32 : i32
    %1 = arith.extui %0 : i1 to i32
    %c0_i32_0 = arith.constant 0 : i32
    %2 = arith.cmpi ne, %1, %c0_i32_0 : i32
    scf.if %2 {
      %cst_10 = arith.constant 0.000000e+00 : f32
      %12 = vector.broadcast %cst_10 : f32 to vector<16x32xf32>
      %c0_11 = arith.constant 0 : index
      %c0_12 = arith.constant 0 : index
      %13 = vector.load %arg10[%c0_11, %c0_12] : memref<16x32xf32, #tpu.memory_space<vmem>>, vector<16x32xf32>
      tpu.vector_store %arg10[%c0_11, %c0_12], %12 {strides = array<i32>} : memref<16x32xf32, #tpu.memory_space<vmem>>, vector<16x32xf32>,
    } else {
    }
    %c0 = arith.constant 0 : index
    %c0_1 = arith.constant 0 : index
    %3 = vector.load %arg10[%c0, %c0_1] : memref<16x32xf32, #tpu.memory_space<vmem>>, vector<16x32xf32>
    %c0_2 = arith.constant 0 : index
    %c0_3 = arith.constant 0 : index
    %4 = vector.load %arg3[%c0_2, %c0_3] : memref<16x64xbf16, #tpu.memory_space<vmem>>, vector<16x64xbf16>
    %c0_4 = arith.constant 0 : index
    %c0_5 = arith.constant 0 : index
    %5 = vector.load %arg4[%c0_4, %c0_5] : memref<64x32xbf16, #tpu.memory_space<vmem>>, vector<64x32xbf16>
    %cst = arith.constant dense<0.000000e+00> : vector<16x32xf32>
    %6 = tpu.matmul %4, %5, %cst {dimension_numbers = #tpu.dot_dimension_numbers<[1], [0], [0], [1], [0, 0, 1, 1], [], []>} : vector<16x64xbf16>, vector<64x32xbf16>, vector<16x32xf32> -> vector<16x32xf32>
    %7 = arith.addf %3, %6 : vector<16x32xf32>
    %c0_6 = arith.constant 0 : index
    %c0_7 = arith.constant 0 : index
    %8 = vector.load %arg10[%c0_6, %c0_7] : memref<16x32xf32, #tpu.memory_space<vmem>>, vector<16x32xf32>
    tpu.vector_store %arg10[%c0_6, %c0_7], %7 {strides = array<i32>} : memref<16x32xf32, #tpu.memory_space<vmem>>, vector<16x32xf32>,
    %c0_i32_8 = arith.constant 0 : i32
    %9 = arith.cmpi eq, %arg2, %c0_i32_8 : i32
    %10 = arith.extui %9 : i1 to i32
    %c0_i32_9 = arith.constant 0 : i32
    %11 = arith.cmpi ne, %10, %c0_i32_9 : i32
    scf.if %11 {
      %c0_10 = arith.constant 0 : index
      %c0_11 = arith.constant 0 : index
      %12 = vector.load %arg10[%c0_10, %c0_11] : memref<16x32xf32, #tpu.memory_space<vmem>>, vector<16x32xf32>
      %c0_12 = arith.constant 0 : index
      %c0_13 = arith.constant 0 : index
      %13 = vector.load %arg5[%c0_12, %c0_13] : memref<1x32xf32, #tpu.memory_space<vmem>>, vector<1x32xf32>
      %14 = vector.broadcast %13 : vector<1x32xf32> to vector<16x32xf32>
      %15 = arith.addf %12, %14 : vector<16x32xf32>
      %c0_14 = arith.constant 0 : index
      %c0_15 = arith.constant 0 : index
      %16 = vector.load %arg6[%c0_14, %c0_15] : memref<16x32xbf16, #tpu.memory_space<vmem>>, vector<16x32xbf16>
      %17 = arith.extf %16 : vector<16x32xbf16> to vector<16x32xf32>
      %18 = arith.addf %15, %17 : vector<16x32xf32>
      %cst_16 = arith.constant dense<0.000000e+00> : vector<16xf32>
      %19 = vector.multi_reduction <add>, %18, %cst_16 [1] : vector<16x32xf32> to vector<16xf32>
      %20 = vector.shape_cast %19 : vector<16xf32> to vector<16x1xf32>
      %cst_17 = arith.constant 3.200000e+01 : f32
      %21 = vector.broadcast %cst_17 : f32 to vector<16x1xf32>
      %22 = arith.divf %20, %21 : vector<16x1xf32>
      %23 = vector.broadcast %22 : vector<16x1xf32> to vector<16x32xf32>
      %24 = arith.subf %18, %23 : vector<16x32xf32>
      %25 = vector.broadcast %22 : vector<16x1xf32> to vector<16x32xf32>
      %26 = arith.subf %18, %25 : vector<16x32xf32>
      %27 = arith.mulf %24, %26 : vector<16x32xf32>
      %cst_18 = arith.constant dense<0.000000e+00> : vector<16xf32>
      %28 = vector.multi_reduction <add>, %27, %cst_18 [1] : vector<16x32xf32> to vector<16xf32>
      %29 = vector.shape_cast %28 : vector<16xf32> to vector<16x1xf32>
      %cst_19 = arith.constant 3.200000e+01 : f32
      %30 = vector.broadcast %cst_19 : f32 to vector<16x1xf32>
      %31 = arith.divf %29, %30 : vector<16x1xf32>
      %32 = vector.broadcast %22 : vector<16x1xf32> to vector<16x32xf32>
      %33 = arith.subf %18, %32 : vector<16x32xf32>
      %cst_20 = arith.constant 9.99999974E-6 : f32
      %34 = vector.broadcast %cst_20 : f32 to vector<16x1xf32>
      %35 = arith.addf %31, %34 : vector<16x1xf32>
      %36 = math.rsqrt %35 : vector<16x1xf32>
      %37 = vector.broadcast %36 : vector<16x1xf32> to vector<16x32xf32>
      %38 = arith.mulf %33, %37 : vector<16x32xf32>
      %c0_21 = arith.constant 0 : index
      %c0_22 = arith.constant 0 : index
      %39 = vector.load %arg7[%c0_21, %c0_22] : memref<1x32xf32, #tpu.memory_space<vmem>>, vector<1x32xf32>
      %40 = vector.broadcast %39 : vector<1x32xf32> to vector<16x32xf32>
      %41 = arith.mulf %38, %40 : vector<16x32xf32>
      %c0_23 = arith.constant 0 : index
      %c0_24 = arith.constant 0 : index
      %42 = vector.load %arg8[%c0_23, %c0_24] : memref<1x32xf32, #tpu.memory_space<vmem>>, vector<1x32xf32>
      %43 = vector.broadcast %42 : vector<1x32xf32> to vector<16x32xf32>
      %44 = arith.addf %41, %43 : vector<16x32xf32>
      %45 = arith.truncf %44 : vector<16x32xf32> to vector<16x32xbf16>
      %c0_25 = arith.constant 0 : index
      %c0_26 = arith.constant 0 : index
      %46 = vector.load %arg9[%c0_25, %c0_26] : memref<16x32xbf16, #tpu.memory_space<vmem>>, vector<16x32xbf16>
      tpu.vector_store %arg9[%c0_25, %c0_26], %45 {strides = array<i32>} : memref<16x32xbf16, #tpu.memory_space<vmem>>, vector<16x32xbf16>,
    } else {
    }
    return
  }
  func.func @transform_0(%arg0: i32, %arg1: i32, %arg2: i32) -> (i32, i32) {
    %c0_i32 = arith.constant 0 : i32
    return %arg0, %arg2 : i32, i32
  }
  func.func @transform_1(%arg0: i32, %arg1: i32, %arg2: i32) -> (i32, i32) {
    %c0_i32 = arith.constant 0 : i32
    %c0_i32_0 = arith.constant 0 : i32
    return %arg2, %c0_i32 : i32, i32
  }
  func.func @transform_2(%arg0: i32, %arg1: i32, %arg2: i32) -> (i32, i32) {
    %c0_i32 = arith.constant 0 : i32
    %c0_i32_0 = arith.constant 0 : i32
    %c0_i32_1 = arith.constant 0 : i32
    return %c0_i32, %c0_i32_0 : i32, i32
  }
  func.func @transform_3(%arg0: i32, %arg1: i32, %arg2: i32) -> (i32, i32) {
    %c0_i32 = arith.constant 0 : i32
    %c0_i32_0 = arith.constant 0 : i32
    return %arg0, %c0_i32 : i32, i32
  }
  func.func @transform_4(%arg0: i32, %arg1: i32, %arg2: i32) -> (i32, i32) {
    %c0_i32 = arith.constant 0 : i32
    %c0_i32_0 = arith.constant 0 : i32
    %c0_i32_1 = arith.constant 0 : i32
    return %c0_i32, %c0_i32_0 : i32, i32
  }
  func.func @transform_5(%arg0: i32, %arg1: i32, %arg2: i32) -> (i32, i32) {
    %c0_i32 = arith.constant 0 : i32
    %c0_i32_0 = arith.constant 0 : i32
    %c0_i32_1 = arith.constant 0 : i32
    return %c0_i32, %c0_i32_0 : i32, i32
  }
  func.func @transform_6(%arg0: i32, %arg1: i32, %arg2: i32) -> (i32, i32) {
    %c0_i32 = arith.constant 0 : i32
    %c0_i32_0 = arith.constant 0 : i32
    return %arg0, %c0_i32 : i32, i32
  }
}

module attributes {stable_mosaic.version = 11 : i64} {
  func.func @_matmul_kernel(%arg0: i32, %arg1: i32, %arg2: i32, %arg3: memref<16x32xbf16, #tpu.memory_space<vmem>>, %arg4: memref<32x64xbf16, #tpu.memory_space<vmem>>, %arg5: memref<1x64xf32, #tpu.memory_space<vmem>>, %arg6: memref<16x64xbf16, #tpu.memory_space<vmem>>, %arg7: memref<16x64xf32, #tpu.memory_space<vmem>>) attributes {dimension_semantics = [#tpu.dimension_semantics<parallel>, #tpu.dimension_semantics<parallel>, #tpu.dimension_semantics<arbitrary>], iteration_bounds = array<i64: 1, 1, 1>, scalar_prefetch = 0 : i64, scratch_operands = 1 : i64, tpu.core_type = #tpu.core_type<tc>, window_params = [{transform_indices = @transform_0, window_bounds = array<i64: 16, 32>}, {transform_indices = @transform_1, window_bounds = array<i64: 32, 64>}, {transform_indices = @transform_2, window_bounds = array<i64: 1, 64>}, {transform_indices = @transform_3, window_bounds = array<i64: 16, 64>}]} {
    %c0_i32 = arith.constant 0 : i32
    %0 = arith.cmpi eq, %arg2, %c0_i32 : i32
    %1 = arith.extui %0 : i1 to i32
    %c0_i32_0 = arith.constant 0 : i32
    %2 = arith.cmpi ne, %1, %c0_i32_0 : i32
    scf.if %2 {
      %cst_10 = arith.constant 0.000000e+00 : f32
      %12 = vector.broadcast %cst_10 : f32 to vector<16x64xf32>
      %c0_11 = arith.constant 0 : index
      %c0_12 = arith.constant 0 : index
      %13 = vector.load %arg7[%c0_11, %c0_12] : memref<16x64xf32, #tpu.memory_space<vmem>>, vector<16x64xf32>
      tpu.vector_store %arg7[%c0_11, %c0_12], %12 {strides = array<i32>} : memref<16x64xf32, #tpu.memory_space<vmem>>, vector<16x64xf32>,
    } else {
    }
    %c0 = arith.constant 0 : index
    %c0_1 = arith.constant 0 : index
    %3 = vector.load %arg7[%c0, %c0_1] : memref<16x64xf32, #tpu.memory_space<vmem>>, vector<16x64xf32>
    %c0_2 = arith.constant 0 : index
    %c0_3 = arith.constant 0 : index
    %4 = vector.load %arg3[%c0_2, %c0_3] : memref<16x32xbf16, #tpu.memory_space<vmem>>, vector<16x32xbf16>
    %c0_4 = arith.constant 0 : index
    %c0_5 = arith.constant 0 : index
    %5 = vector.load %arg4[%c0_4, %c0_5] : memref<32x64xbf16, #tpu.memory_space<vmem>>, vector<32x64xbf16>
    %cst = arith.constant dense<0.000000e+00> : vector<16x64xf32>
    %6 = tpu.matmul %4, %5, %cst {dimension_numbers = #tpu.dot_dimension_numbers<[1], [0], [0], [1], [0, 0, 1, 1], [], []>} : vector<16x32xbf16>, vector<32x64xbf16>, vector<16x64xf32> -> vector<16x64xf32>
    %7 = arith.addf %3, %6 : vector<16x64xf32>
    %c0_6 = arith.constant 0 : index
    %c0_7 = arith.constant 0 : index
    %8 = vector.load %arg7[%c0_6, %c0_7] : memref<16x64xf32, #tpu.memory_space<vmem>>, vector<16x64xf32>
    tpu.vector_store %arg7[%c0_6, %c0_7], %7 {strides = array<i32>} : memref<16x64xf32, #tpu.memory_space<vmem>>, vector<16x64xf32>,
    %c0_i32_8 = arith.constant 0 : i32
    %9 = arith.cmpi eq, %arg2, %c0_i32_8 : i32
    %10 = arith.extui %9 : i1 to i32
    %c0_i32_9 = arith.constant 0 : i32
    %11 = arith.cmpi ne, %10, %c0_i32_9 : i32
    scf.if %11 {
      %c0_10 = arith.constant 0 : index
      %c0_11 = arith.constant 0 : index
      %12 = vector.load %arg7[%c0_10, %c0_11] : memref<16x64xf32, #tpu.memory_space<vmem>>, vector<16x64xf32>
      %c0_12 = arith.constant 0 : index
      %c0_13 = arith.constant 0 : index
      %13 = vector.load %arg5[%c0_12, %c0_13] : memref<1x64xf32, #tpu.memory_space<vmem>>, vector<1x64xf32>
      %14 = vector.broadcast %13 : vector<1x64xf32> to vector<16x64xf32>
      %15 = arith.addf %12, %14 : vector<16x64xf32>
      %16 = arith.truncf %15 : vector<16x64xf32> to vector<16x64xbf16>
      %c0_14 = arith.constant 0 : index
      %c0_15 = arith.constant 0 : index
      %17 = vector.load %arg6[%c0_14, %c0_15] : memref<16x64xbf16, #tpu.memory_space<vmem>>, vector<16x64xbf16>
      tpu.vector_store %arg6[%c0_14, %c0_15], %16 {strides = array<i32>} : memref<16x64xbf16, #tpu.memory_space<vmem>>, vector<16x64xbf16>,
    } else {
    }
    return
  }
  func.func @transform_0(%arg0: i32, %arg1: i32, %arg2: i32) -> (i32, i32) {
    %c0_i32 = arith.constant 0 : i32
    return %arg0, %arg2 : i32, i32
  }
  func.func @transform_1(%arg0: i32, %arg1: i32, %arg2: i32) -> (i32, i32) {
    %c0_i32 = arith.constant 0 : i32
    return %arg2, %arg1 : i32, i32
  }
  func.func @transform_2(%arg0: i32, %arg1: i32, %arg2: i32) -> (i32, i32) {
    %c0_i32 = arith.constant 0 : i32
    %c0_i32_0 = arith.constant 0 : i32
    return %c0_i32, %arg1 : i32, i32
  }
  func.func @transform_3(%arg0: i32, %arg1: i32, %arg2: i32) -> (i32, i32) {
    %c0_i32 = arith.constant 0 : i32
    return %arg0, %arg1 : i32, i32
  }
}

module attributes {stable_mosaic.version = 11 : i64} {
  func.func @_matmul_kernel(%arg0: i32, %arg1: i32, %arg2: i32, %arg3: memref<16x32xbf16, #tpu.memory_space<vmem>>, %arg4: memref<32x16xbf16, #tpu.memory_space<vmem>>, %arg5: memref<1x16xf32, #tpu.memory_space<vmem>>, %arg6: memref<16x16xf32, #tpu.memory_space<vmem>>, %arg7: memref<16x16xf32, #tpu.memory_space<vmem>>) attributes {dimension_semantics = [#tpu.dimension_semantics<parallel>, #tpu.dimension_semantics<parallel>, #tpu.dimension_semantics<arbitrary>], iteration_bounds = array<i64: 1, 1, 1>, scalar_prefetch = 0 : i64, scratch_operands = 1 : i64, tpu.core_type = #tpu.core_type<tc>, window_params = [{transform_indices = @transform_0, window_bounds = array<i64: 16, 32>}, {transform_indices = @transform_1, window_bounds = array<i64: 32, 16>}, {transform_indices = @transform_2, window_bounds = array<i64: 1, 16>}, {transform_indices = @transform_3, window_bounds = array<i64: 16, 16>}]} {
    %c0_i32 = arith.constant 0 : i32
    %0 = arith.cmpi eq, %arg2, %c0_i32 : i32
    %1 = arith.extui %0 : i1 to i32
    %c0_i32_0 = arith.constant 0 : i32
    %2 = arith.cmpi ne, %1, %c0_i32_0 : i32
    scf.if %2 {
      %cst_10 = arith.constant 0.000000e+00 : f32
      %12 = vector.broadcast %cst_10 : f32 to vector<16x16xf32>
      %c0_11 = arith.constant 0 : index
      %c0_12 = arith.constant 0 : index
      %13 = vector.load %arg7[%c0_11, %c0_12] : memref<16x16xf32, #tpu.memory_space<vmem>>, vector<16x16xf32>
      tpu.vector_store %arg7[%c0_11, %c0_12], %12 {strides = array<i32>} : memref<16x16xf32, #tpu.memory_space<vmem>>, vector<16x16xf32>,
    } else {
    }
    %c0 = arith.constant 0 : index
    %c0_1 = arith.constant 0 : index
    %3 = vector.load %arg7[%c0, %c0_1] : memref<16x16xf32, #tpu.memory_space<vmem>>, vector<16x16xf32>
    %c0_2 = arith.constant 0 : index
    %c0_3 = arith.constant 0 : index
    %4 = vector.load %arg3[%c0_2, %c0_3] : memref<16x32xbf16, #tpu.memory_space<vmem>>, vector<16x32xbf16>
    %c0_4 = arith.constant 0 : index
    %c0_5 = arith.constant 0 : index
    %5 = vector.load %arg4[%c0_4, %c0_5] : memref<32x16xbf16, #tpu.memory_space<vmem>>, vector<32x16xbf16>
    %cst = arith.constant dense<0.000000e+00> : vector<16x16xf32>
    %6 = tpu.matmul %4, %5, %cst {dimension_numbers = #tpu.dot_dimension_numbers<[1], [0], [0], [1], [0, 0, 1, 1], [], []>} : vector<16x32xbf16>, vector<32x16xbf16>, vector<16x16xf32> -> vector<16x16xf32>
    %7 = arith.addf %3, %6 : vector<16x16xf32>
    %c0_6 = arith.constant 0 : index
    %c0_7 = arith.constant 0 : index
    %8 = vector.load %arg7[%c0_6, %c0_7] : memref<16x16xf32, #tpu.memory_space<vmem>>, vector<16x16xf32>
    tpu.vector_store %arg7[%c0_6, %c0_7], %7 {strides = array<i32>} : memref<16x16xf32, #tpu.memory_space<vmem>>, vector<16x16xf32>,
    %c0_i32_8 = arith.constant 0 : i32
    %9 = arith.cmpi eq, %arg2, %c0_i32_8 : i32
    %10 = arith.extui %9 : i1 to i32
    %c0_i32_9 = arith.constant 0 : i32
    %11 = arith.cmpi ne, %10, %c0_i32_9 : i32
    scf.if %11 {
      %c0_10 = arith.constant 0 : index
      %c0_11 = arith.constant 0 : index
      %12 = vector.load %arg7[%c0_10, %c0_11] : memref<16x16xf32, #tpu.memory_space<vmem>>, vector<16x16xf32>
      %c0_12 = arith.constant 0 : index
      %c0_13 = arith.constant 0 : index
      %13 = vector.load %arg5[%c0_12, %c0_13] : memref<1x16xf32, #tpu.memory_space<vmem>>, vector<1x16xf32>
      %14 = vector.broadcast %13 : vector<1x16xf32> to vector<16x16xf32>
      %15 = arith.addf %12, %14 : vector<16x16xf32>
      %c0_14 = arith.constant 0 : index
      %c0_15 = arith.constant 0 : index
      %16 = vector.load %arg6[%c0_14, %c0_15] : memref<16x16xf32, #tpu.memory_space<vmem>>, vector<16x16xf32>
      tpu.vector_store %arg6[%c0_14, %c0_15], %15 {strides = array<i32>} : memref<16x16xf32, #tpu.memory_space<vmem>>, vector<16x16xf32>,
    } else {
    }
    return
  }
  func.func @transform_0(%arg0: i32, %arg1: i32, %arg2: i32) -> (i32, i32) {
    %c0_i32 = arith.constant 0 : i32
    return %arg0, %arg2 : i32, i32
  }
  func.func @transform_1(%arg0: i32, %arg1: i32, %arg2: i32) -> (i32, i32) {
    %c0_i32 = arith.constant 0 : i32
    return %arg2, %arg1 : i32, i32
  }
  func.func @transform_2(%arg0: i32, %arg1: i32, %arg2: i32) -> (i32, i32) {
    %c0_i32 = arith.constant 0 : i32
    %c0_i32_0 = arith.constant 0 : i32
    return %c0_i32, %arg1 : i32, i32
  }
  func.func @transform_3(%arg0: i32, %arg1: i32, %arg2: i32) -> (i32, i32) {
    %c0_i32 = arith.constant 0 : i32
    return %arg0, %arg1 : i32, i32
  }
}

module attributes {stable_mosaic.version = 11 : i64} {
  func.func @_flash_attn_kernel(%arg0: i32, %arg1: i32, %arg2: i32, %arg3: i32, %arg4: memref<1x1x1x8x8xbf16, #tpu.memory_space<vmem>>, %arg5: memref<1x1x1x8x8xbf16, #tpu.memory_space<vmem>>, %arg6: memref<1x1x1x8x8xbf16, #tpu.memory_space<vmem>>, %arg7: memref<1x1x8xf32, #tpu.memory_space<vmem>>, %arg8: memref<1x1x8x8xbf16, #tpu.memory_space<vmem>>, %arg9: memref<8x1xf32, #tpu.memory_space<vmem>>, %arg10: memref<8x1xf32, #tpu.memory_space<vmem>>, %arg11: memref<8x8xf32, #tpu.memory_space<vmem>>) attributes {dimension_semantics = [#tpu.dimension_semantics<parallel>, #tpu.dimension_semantics<parallel>, #tpu.dimension_semantics<parallel>, #tpu.dimension_semantics<arbitrary>], iteration_bounds = array<i64: 2, 4, 1, 1>, scalar_prefetch = 0 : i64, scratch_operands = 3 : i64, tpu.core_type = #tpu.core_type<tc>, window_params = [{transform_indices = @transform_0, window_bounds = array<i64: 1, 1, 1, 8, 8>}, {transform_indices = @transform_1, window_bounds = array<i64: 1, 1, 1, 8, 8>}, {transform_indices = @transform_2, window_bounds = array<i64: 1, 1, 1, 8, 8>}, {transform_indices = @transform_3, window_bounds = array<i64: 1, 1, 8>}, {transform_indices = @transform_4, window_bounds = array<i64: 1, 1, 8, 8>}]} {
    %c0_i32 = arith.constant 0 : i32
    %0 = arith.cmpi eq, %arg3, %c0_i32 : i32
    %1 = arith.extui %0 : i1 to i32
    %c0_i32_0 = arith.constant 0 : i32
    %2 = arith.cmpi ne, %1, %c0_i32_0 : i32
    scf.if %2 {
      %cst_37 = arith.constant -1.000000e+30 : f32
      %44 = vector.broadcast %cst_37 : f32 to vector<8x1xf32>
      %c0_38 = arith.constant 0 : index
      %c0_39 = arith.constant 0 : index
      %45 = vector.load %arg9[%c0_38, %c0_39] : memref<8x1xf32, #tpu.memory_space<vmem>>, vector<8x1xf32>
      tpu.vector_store %arg9[%c0_38, %c0_39], %44 {strides = array<i32>} : memref<8x1xf32, #tpu.memory_space<vmem>>, vector<8x1xf32>,
      %cst_40 = arith.constant 0.000000e+00 : f32
      %46 = vector.broadcast %cst_40 : f32 to vector<8x1xf32>
      %c0_41 = arith.constant 0 : index
      %c0_42 = arith.constant 0 : index
      %47 = vector.load %arg10[%c0_41, %c0_42] : memref<8x1xf32, #tpu.memory_space<vmem>>, vector<8x1xf32>
      tpu.vector_store %arg10[%c0_41, %c0_42], %46 {strides = array<i32>} : memref<8x1xf32, #tpu.memory_space<vmem>>, vector<8x1xf32>,
      %cst_43 = arith.constant 0.000000e+00 : f32
      %48 = vector.broadcast %cst_43 : f32 to vector<8x8xf32>
      %c0_44 = arith.constant 0 : index
      %c0_45 = arith.constant 0 : index
      %49 = vector.load %arg11[%c0_44, %c0_45] : memref<8x8xf32, #tpu.memory_space<vmem>>, vector<8x8xf32>
      tpu.vector_store %arg11[%c0_44, %c0_45], %48 {strides = array<i32>} : memref<8x8xf32, #tpu.memory_space<vmem>>, vector<8x8xf32>,
    } else {
    }
    %c0 = arith.constant 0 : index
    %c0_1 = arith.constant 0 : index
    %c0_2 = arith.constant 0 : index
    %c0_3 = arith.constant 0 : index
    %c0_4 = arith.constant 0 : index
    %3 = vector.load %arg4[%c0, %c0_1, %c0_2, %c0_3, %c0_4] : memref<1x1x1x8x8xbf16, #tpu.memory_space<vmem>>, vector<1x1x1x8x8xbf16>
    %4 = vector.shape_cast %3 : vector<1x1x1x8x8xbf16> to vector<8x8xbf16>
    %c0_5 = arith.constant 0 : index
    %c0_6 = arith.constant 0 : index
    %c0_7 = arith.constant 0 : index
    %c0_8 = arith.constant 0 : index
    %c0_9 = arith.constant 0 : index
    %5 = vector.load %arg5[%c0_5, %c0_6, %c0_7, %c0_8, %c0_9] : memref<1x1x1x8x8xbf16, #tpu.memory_space<vmem>>, vector<1x1x1x8x8xbf16>
    %6 = vector.shape_cast %5 : vector<1x1x1x8x8xbf16> to vector<8x8xbf16>
    %c0_10 = arith.constant 0 : index
    %c0_11 = arith.constant 0 : index
    %c0_12 = arith.constant 0 : index
    %c0_13 = arith.constant 0 : index
    %c0_14 = arith.constant 0 : index
    %7 = vector.load %arg6[%c0_10, %c0_11, %c0_12, %c0_13, %c0_14] : memref<1x1x1x8x8xbf16, #tpu.memory_space<vmem>>, vector<1x1x1x8x8xbf16>
    %8 = vector.shape_cast %7 : vector<1x1x1x8x8xbf16> to vector<8x8xbf16>
    %cst = arith.constant dense<0.000000e+00> : vector<8x8xf32>
    %9 = tpu.matmul %4, %6, %cst {dimension_numbers = #tpu.dot_dimension_numbers<[1], [1], [0], [0], [0, 0, 1, 0], [], []>} : vector<8x8xbf16>, vector<8x8xbf16>, vector<8x8xf32> -> vector<8x8xf32>
    %c0_15 = arith.constant 0 : index
    %c0_16 = arith.constant 0 : index
    %c0_17 = arith.constant 0 : index
    %10 = vector.load %arg7[%c0_15, %c0_16, %c0_17] : memref<1x1x8xf32, #tpu.memory_space<vmem>>, vector<1x1x8xf32>
    %11 = vector.shape_cast %10 : vector<1x1x8xf32> to vector<1x8xf32>
    %cst_18 = arith.constant 5.000000e-01 : f32
    %12 = vector.broadcast %cst_18 : f32 to vector<1x8xf32>
    %13 = arith.cmpf ogt, %11, %12 : vector<1x8xf32>
    %cst_19 = arith.constant -1.000000e+09 : f32
    %14 = vector.shape_cast %13 : vector<1x8xi1> to vector<1x8xi1>
    %15 = vector.broadcast %14 : vector<1x8xi1> to vector<8x8xi1>
    %16 = vector.broadcast %cst_19 : f32 to vector<8x8xf32>
    %17 = arith.select %15, %9, %16 : vector<8x8xi1>, vector<8x8xf32>
    %c0_20 = arith.constant 0 : index
    %c0_21 = arith.constant 0 : index
    %18 = vector.load %arg9[%c0_20, %c0_21] : memref<8x1xf32, #tpu.memory_space<vmem>>, vector<8x1xf32>
    %cst_22 = arith.constant dense<0xFF800000> : vector<8xf32>
    %19 = vector.multi_reduction <maximumf>, %17, %cst_22 [1] : vector<8x8xf32> to vector<8xf32>
    %20 = vector.shape_cast %19 : vector<8xf32> to vector<8x1xf32>
    %21 = arith.maximumf %18, %20 : vector<8x1xf32>
    %22 = arith.subf %18, %21 : vector<8x1xf32>
    %23 = math.exp %22 : vector<8x1xf32>
    %24 = vector.broadcast %21 : vector<8x1xf32> to vector<8x8xf32>
    %25 = arith.subf %17, %24 : vector<8x8xf32>
    %26 = math.exp %25 : vector<8x8xf32>
    %c0_23 = arith.constant 0 : index
    %c0_24 = arith.constant 0 : index
    %27 = vector.load %arg10[%c0_23, %c0_24] : memref<8x1xf32, #tpu.memory_space<vmem>>, vector<8x1xf32>
    %28 = arith.mulf %23, %27 : vector<8x1xf32>
    %cst_25 = arith.constant dense<0.000000e+00> : vector<8xf32>
    %29 = vector.multi_reduction <add>, %26, %cst_25 [1] : vector<8x8xf32> to vector<8xf32>
    %30 = vector.shape_cast %29 : vector<8xf32> to vector<8x1xf32>
    %31 = arith.addf %28, %30 : vector<8x1xf32>
    %c0_26 = arith.constant 0 : index
    %c0_27 = arith.constant 0 : index
    %32 = vector.load %arg10[%c0_26, %c0_27] : memref<8x1xf32, #tpu.memory_space<vmem>>, vector<8x1xf32>
    tpu.vector_store %arg10[%c0_26, %c0_27], %31 {strides = array<i32>} : memref<8x1xf32, #tpu.memory_space<vmem>>, vector<8x1xf32>,
    %c0_28 = arith.constant 0 : index
    %c0_29 = arith.constant 0 : index
    %33 = vector.load %arg11[%c0_28, %c0_29] : memref<8x8xf32, #tpu.memory_space<vmem>>, vector<8x8xf32>
    %34 = vector.broadcast %23 : vector<8x1xf32> to vector<8x8xf32>
    %35 = arith.mulf %34, %33 : vector<8x8xf32>
    %36 = arith.truncf %26 : vector<8x8xf32> to vector<8x8xbf16>
    %cst_30 = arith.constant dense<0.000000e+00> : vector<8x8xf32>
    %37 = tpu.matmul %36, %8, %cst_30 {dimension_numbers = #tpu.dot_dimension_numbers<[1], [0], [0], [1], [0, 0, 1, 1], [], []>} : vector<8x8xbf16>, vector<8x8xbf16>, vector<8x8xf32> -> vector<8x8xf32>
    %38 = arith.addf %35, %37 : vector<8x8xf32>
    %c0_31 = arith.constant 0 : index
    %c0_32 = arith.constant 0 : index
    %39 = vector.load %arg11[%c0_31, %c0_32] : memref<8x8xf32, #tpu.memory_space<vmem>>, vector<8x8xf32>
    tpu.vector_store %arg11[%c0_31, %c0_32], %38 {strides = array<i32>} : memref<8x8xf32, #tpu.memory_space<vmem>>, vector<8x8xf32>,
    %c0_33 = arith.constant 0 : index
    %c0_34 = arith.constant 0 : index
    %40 = vector.load %arg9[%c0_33, %c0_34] : memref<8x1xf32, #tpu.memory_space<vmem>>, vector<8x1xf32>
    tpu.vector_store %arg9[%c0_33, %c0_34], %21 {strides = array<i32>} : memref<8x1xf32, #tpu.memory_space<vmem>>, vector<8x1xf32>,
    %c0_i32_35 = arith.constant 0 : i32
    %41 = arith.cmpi eq, %arg3, %c0_i32_35 : i32
    %42 = arith.extui %41 : i1 to i32
    %c0_i32_36 = arith.constant 0 : i32
    %43 = arith.cmpi ne, %42, %c0_i32_36 : i32
    scf.if %43 {
      %c0_37 = arith.constant 0 : index
      %c0_38 = arith.constant 0 : index
      %44 = vector.load %arg11[%c0_37, %c0_38] : memref<8x8xf32, #tpu.memory_space<vmem>>, vector<8x8xf32>
      %c0_39 = arith.constant 0 : index
      %c0_40 = arith.constant 0 : index
      %45 = vector.load %arg10[%c0_39, %c0_40] : memref<8x1xf32, #tpu.memory_space<vmem>>, vector<8x1xf32>
      %46 = tpu.reciprocal %45 {approx = true} : vector<8x1xf32> -> vector<8x1xf32>
      %47 = vector.broadcast %46 : vector<8x1xf32> to vector<8x8xf32>
      %48 = arith.mulf %44, %47 : vector<8x8xf32>
      %49 = arith.truncf %48 : vector<8x8xf32> to vector<8x8xbf16>
      %c0_41 = arith.constant 0 : index
      %c0_42 = arith.constant 0 : index
      %c0_43 = arith.constant 0 : index
      %c0_44 = arith.constant 0 : index
      %50 = vector.load %arg8[%c0_41, %c0_42, %c0_43, %c0_44] : memref<1x1x8x8xbf16, #tpu.memory_space<vmem>>, vector<1x1x8x8xbf16>
      %51 = vector.shape_cast %50 : vector<1x1x8x8xbf16> to vector<8x8xbf16>
      %52 = vector.shape_cast %49 : vector<8x8xbf16> to vector<1x1x8x8xbf16>
      tpu.vector_store %arg8[%c0_41, %c0_42, %c0_43, %c0_44], %52 {strides = array<i32>} : memref<1x1x8x8xbf16, #tpu.memory_space<vmem>>, vector<1x1x8x8xbf16>,
    } else {
    }
    return
  }
  func.func @transform_0(%arg0: i32, %arg1: i32, %arg2: i32, %arg3: i32) -> (i32, i32, i32, i32, i32) {
    %c0_i32 = arith.constant 0 : i32
    %c0_i32_0 = arith.constant 0 : i32
    %c0_i32_1 = arith.constant 0 : i32
    return %c0_i32, %arg0, %arg1, %arg2, %c0_i32_0 : i32, i32, i32, i32, i32
  }
  func.func @transform_1(%arg0: i32, %arg1: i32, %arg2: i32, %arg3: i32) -> (i32, i32, i32, i32, i32) {
    %c0_i32 = arith.constant 0 : i32
    %c0_i32_0 = arith.constant 0 : i32
    %c0_i32_1 = arith.constant 0 : i32
    return %c0_i32, %arg0, %arg1, %arg3, %c0_i32_0 : i32, i32, i32, i32, i32
  }
  func.func @transform_2(%arg0: i32, %arg1: i32, %arg2: i32, %arg3: i32) -> (i32, i32, i32, i32, i32) {
    %c1_i32 = arith.constant 1 : i32
    %c0_i32 = arith.constant 0 : i32
    %c0_i32_0 = arith.constant 0 : i32
    return %c1_i32, %arg0, %arg1, %arg3, %c0_i32 : i32, i32, i32, i32, i32
  }
  func.func @transform_3(%arg0: i32, %arg1: i32, %arg2: i32, %arg3: i32) -> (i32, i32, i32) {
    %c0_i32 = arith.constant 0 : i32
    %c0_i32_0 = arith.constant 0 : i32
    return %arg0, %c0_i32, %arg3 : i32, i32, i32
  }
  func.func @transform_4(%arg0: i32, %arg1: i32, %arg2: i32, %arg3: i32) -> (i32, i32, i32, i32) {
    %c0_i32 = arith.constant 0 : i32
    %c0_i32_0 = arith.constant 0 : i32
    return %arg0, %arg1, %arg2, %c0_i32 : i32, i32, i32, i32
  }
}

</mosaic_0001>

<bundles_post_ra>
// kernel: transformer_forward.39
= control target key start
LH: loop header
LB: loop body
LE: loop exit
PB: predicated region body
PF: predicated region fallthrough
CT: control target
= control target key end

     0   :  { %vm19_vm0 = vcmask 785408   ;;  %v151_v0 = vmov 0.0   ;;  %vm152_vm1 = vmmov 0   ;;  %vm47_vm2 = vcmask 261120   ;;  %s195_s1 = inlined_call_operand.vmem [shape: bf16[32,96], index: 1, kind: input, shape index: {}]   ;;  %s196_s0 = inlined_call_operand.vmem [shape: bf16[16,32], index: 0, kind: input, shape index: {}]   ;;  %s197_s2 = inlined_call_operand.vmem [shape: f32[1,96], index: 2, kind: input, shape index: {}]   ;;  %s198_s3 = inlined_call_operand.vmem [shape: bf16[16,96], index: 3, kind: output, shape index: {}]  }
   0x1   :  { %138 = vmatprep.subr.bf16.mxu0 %v151_v0  ;;  %v148_v1 = vld [vmem:[%s195_s1] sm:$0xff]   ;;  %142 = vmatprep.mubr.msk.bf16.mxu0 %vm152_vm1, %v151_v0  ;;  %20 = vst.msk [vmem:[#allocation2] sm:$0xff] %vm19_vm0, %v151_v0  ;;  %21 = vst.msk [vmem:[#allocation2 + $0x8] sm:$0xff] %vm19_vm0, %v151_v0  ;;  %v149_v2 = vld [vmem:[%s195_s1 + $0x8] sm:$0xff]   ;;  %vm119_vm3 = vcmask 781312  }
   0x2   :  { %139 = vmatpush3.bf16.msra.mxu0 %v148_v1  ;;  %v150_v3 = vld [vmem:[%s196_s0] sm:$0xff]  }
   0x3   :  { %140 = vmatprep.subr.bf16.mxu0 %v151_v0  ;;  %v130_v12 = vld [vmem:[%s197_s2] ss:$0 sm:$0xff] }
   0x6   :  { %141 = vmatpush3.bf16.msra.mxu0 %v149_v2 }
   0x8   :  { %v22_v4 = vld [vmem:[#allocation2] sm:$0xff]  ;;  %v23_v6 = vld [vmem:[#allocation2 + $0x8] sm:$0xff] }
   0x9   :  { %143 = vmatmul.mubr.msk.bf16.vlgmr.msra.gmra.mrb[0].mxu0 %vm47_vm2, %v150_v3 }
  0xdc   :  { %v85_v5 = vpop.f32.mrb[0].mxu0 }
  0xdd   :  { %v92_v7 = vadd.f32 %v85_v5, %v22_v4  ;;  %v144_v8 = vpop.f32.mrb[1].mxu0 }
  0xde   :  { %v88_v9 = vpop.f32.mrb[2].mxu0 }
  0xdf   :  { %95 = vst.msk [vmem:[#allocation2] sm:$0xff] %vm19_vm0, %v92_v7  ;;  %v93_v10 = vadd.f32 %v88_v9, %v23_v6  ;;  %v145_v11 = vpop.f32.mrb[3].mxu0 }
  0xe1   :  { %96 = vst.msk [vmem:[#allocation2 + $0x8] sm:$0xff] %vm19_vm0, %v93_v10 }
  0xe6   :  { %v100_v13 = vld [vmem:[#allocation2] sm:$0xff] }
  0xe7   :  { %v109_v14 = vadd.f32 %v130_v12, %v100_v13 }
  0xe8   :  { %v101_v15 = vld [vmem:[#allocation2 + $0x8] sm:$0xff] }
  0xe9   :  { %v133_v16 = vpack.c.bf16 %v109_v14, %v109_v14  ;;  %v110_v17 = vadd.f32 %v130_v12, %v101_v15 }
  0xeb   :  { %120 = vst.msk [vmem:[%s198_s3] sm:$0xf] %vm119_vm3, %v133_v16  ;;  %v134_v18 = vpack.c.bf16 %v110_v17, %v110_v17 }
  0xed   :  { %121 = vst.msk [vmem:[%s198_s3 + $0x4] sm:$0xf] %vm119_vm3, %v134_v18 }

// kernel: transformer_forward.42
= control target key start
LH: loop header
LB: loop body
LE: loop exit
PB: predicated region body
PF: predicated region fallthrough
CT: control target
= control target key end

     0   :  { %vm19_vm0 = vcmask 261120   ;;  %v150_v0 = vmov 0.0   ;;  %vm151_vm1 = vmmov 0   ;;  %vm118_vm2 = vcmask 257024   ;;  %s195_s1 = inlined_call_operand.vmem [shape: bf16[32,32], index: 1, kind: input, shape index: {}]   ;;  %s196_s0 = inlined_call_operand.vmem [shape: bf16[16,32], index: 0, kind: input, shape index: {}]   ;;  %s197_s2 = inlined_call_operand.vmem [shape: f32[1,32], index: 2, kind: input, shape index: {}]   ;;  %s198_s3 = inlined_call_operand.vmem [shape: bf16[16,32], index: 3, kind: output, shape index: {}]  }
   0x1   :  { %137 = vmatprep.subr.bf16.mxu0 %v150_v0  ;;  %v147_v1 = vld [vmem:[%s195_s1] sm:$0xff]   ;;  %141 = vmatprep.mubr.msk.bf16.mxu0 %vm151_vm1, %v150_v0  ;;  %20 = vst.msk [vmem:[#allocation2] sm:$0xff] %vm19_vm0, %v150_v0  ;;  %21 = vst.msk [vmem:[#allocation2 + $0x8] sm:$0xff] %vm19_vm0, %v150_v0  ;;  %v148_v2 = vld [vmem:[%s195_s1 + $0x8] sm:$0xff]  }
   0x2   :  { %138 = vmatpush3.bf16.msra.mxu0 %v147_v1  ;;  %v149_v3 = vld [vmem:[%s196_s0] sm:$0xff]  }
   0x3   :  { %139 = vmatprep.subr.bf16.mxu0 %v150_v0  ;;  %v129_v12 = vld [vmem:[%s197_s2] ss:$0 sm:$0xff] }
   0x6   :  { %140 = vmatpush3.bf16.msra.mxu0 %v148_v2 }
   0x8   :  { %v22_v4 = vld [vmem:[#allocation2] sm:$0xff]  ;;  %v23_v6 = vld [vmem:[#allocation2 + $0x8] sm:$0xff] }
   0x9   :  { %142 = vmatmul.mubr.msk.bf16.vlgmr.msra.gmra.mrb[0].mxu0 %vm19_vm0, %v149_v3 }
  0xdc   :  { %v85_v5 = vpop.f32.mrb[0].mxu0 }
  0xdd   :  { %v92_v7 = vadd.f32 %v85_v5, %v22_v4  ;;  %v143_v8 = vpop.f32.mrb[1].mxu0 }
  0xde   :  { %v88_v9 = vpop.f32.mrb[2].mxu0 }
  0xdf   :  { %94 = vst.msk [vmem:[#allocation2] sm:$0xff] %vm19_vm0, %v92_v7  ;;  %v93_v10 = vadd.f32 %v88_v9, %v23_v6  ;;  %v144_v11 = vpop.f32.mrb[3].mxu0 }
  0xe1   :  { %95 = vst.msk [vmem:[#allocation2 + $0x8] sm:$0xff] %vm19_vm0, %v93_v10 }
  0xe6   :  { %v99_v13 = vld [vmem:[#allocation2] sm:$0xff] }
  0xe7   :  { %v108_v14 = vadd.f32 %v129_v12, %v99_v13 }
  0xe8   :  { %v100_v15 = vld [vmem:[#allocation2 + $0x8] sm:$0xff] }
  0xe9   :  { %v132_v16 = vpack.c.bf16 %v108_v14, %v108_v14  ;;  %v109_v17 = vadd.f32 %v129_v12, %v100_v15 }
  0xeb   :  { %119 = vst.msk [vmem:[%s198_s3] sm:$0xf] %vm118_vm2, %v132_v16  ;;  %v133_v18 = vpack.c.bf16 %v109_v17, %v109_v17 }
  0xed   :  { %120 = vst.msk [vmem:[%s198_s3 + $0x4] sm:$0xf] %vm118_vm2, %v133_v18 }

// kernel: transformer_forward.40
= control target key start
LH: loop header
LB: loop body
LE: loop exit
PB: predicated region body
PF: predicated region fallthrough
CT: control target
= control target key end

     0   :  { %s887_s15 = smov 0   ;;  %s889_s16 = smov 0   ;;  %s964_s0 = inlined_call_operand.vmem [shape: bf16[3,2,4,8,8], index: 0, kind: input, shape index: {}, may-alias: {0,1,2}]   ;;  %s965_s1 = inlined_call_operand.vmem [shape: bf16[3,2,4,8,8], index: 1, kind: input, shape index: {}, may-alias: {0,1,2}]   ;;  %s966_s2 = inlined_call_operand.vmem [shape: bf16[3,2,4,8,8], index: 2, kind: input, shape index: {}, may-alias: {0,1,2}]   ;;  %s967_s3 = inlined_call_operand.vmem [shape: f32[2,8,1], index: 3, kind: input, shape index: {}]   ;;  %s968_s4 = inlined_call_operand.vmem [shape: bf16[2,4,8,8], index: 4, kind: output, shape index: {}]  }
   0x1   :  { %s891_s17 = smov 0   ;;  %s893_s18 = smov 0  }
   0x2   :  { %s895_s19 = smov 0  }
   0x3 LB: > { %s36_s20 = sadd.s32 1, %s848_s17  ;;  %s40_s21 = sadd.s32 1, %s852_s18  ;;  %s856_s19 = sphi %s895_s19, %s14_s19   ;;  %s852_s18 = sphi %s893_s18, %s972_s18   ;;  %s848_s17 = sphi %s891_s17, %s971_s17   ;;  %s844_s16 = sphi %s889_s16, %s970_s16   ;;  %s840_s15 = sphi %s887_s15, %s969_s15  }
   0x4   : > { %p38_p0 = scmp.ge.s32.totalorder %s36_s20, 4  ;;  %p734_p1 = scmp.ge.s32.totalorder %s856_s19, 1 }
   0x5   : > { %p258_p2 = scmp.lt.s32.totalorder %s856_s19, 9 }
   0x6   : > { %s974_s20 = smov (%p38_p0, %s36_s20), 0  ;;  %s976_s21 = smov (!%p38_p0, %s40_s21), %s852_s18 }
   0x7   : > { %p259_p3 = pnand %p734_p1, %p258_p2  ;;  %p42_p4 = scmp.ge.s32.totalorder %s976_s21, 2 }
   0x8   : > { %p327_p5 = scmp.lt.s32.totalorder (!%p259_p3), %s844_s16, 1  ;;  %p329_p6 = scmp.lt.s32.totalorder (!%p259_p3), %s840_s15, 3  ;;  %vm388_vm0 = vcmask (!%p259_p3), 64512   ;;  %v858_v0 = vmov (!%p259_p3), 0.0   ;;  %vm859_vm1 = vmmov (!%p259_p3), 0   ;;  %v860_v1 = vmov (!%p259_p3), 0  }
   0x9   : > { %s978_s21 = smov (%p42_p4, %s976_s21), 0  ;;  %262 = sbr.rel (%p259_p3) target bundleno = 828 (0x33c), region = 36 }
   0xa   : > { %754 = vmatprep.subr.bf16.mxu0 (!%p259_p3), %v858_v0  ;;  %389 = vst.msk [vmem:[#allocation4] sm:$0xff] (!%p259_p3), %vm388_vm0, %v858_v0  ;;  %756 = vmatprep.mubr.msk.bf16.mxu0 (!%p259_p3), %vm859_vm1, %v858_v0  ;;  %vm385_vm3 = vcmask (!%p259_p3), 7168   ;;  %v861_v7 = vmov (!%p259_p3), -1e+30   ;;  %v449_v8 = vlaneseq (!%p259_p3)  ;;  %vm500_vm7 = vcmask (!%p259_p3), 1043456  }
   0xb   : > { %810 = vset.pattern.permute.xlu0 (!%p259_p3), %v860_v1  ;;  %811 = vset.pattern.permute.xlu1 (!%p259_p3), %v860_v1  ;;  %386 = vst.msk [vmem:[#allocation2] sm:$0xff] (!%p259_p3), %vm385_vm3, %v861_v7  ;;  %387 = vst.msk [vmem:[#allocation3] sm:$0xff] (!%p259_p3), %vm385_vm3, %v858_v0  ;;  %vm560_vm8 = vcmask (!%p259_p3), 60416  }
   0xc   : > { %760 = vmatprep.subr.bf16.mxu1 (!%p259_p3), %v858_v0  ;;  %762 = vmatprep.mubr.msk.bf16.mxu1 (!%p259_p3), %vm859_vm1, %v858_v0  ;;  %v450_v9 = vshrl.u32 (!%p259_p3), %v449_v8, 7  ;;  %v454_v10 = vand.u32 (!%p259_p3), 127, %v449_v8 }
   0xe   : > { %vm457_vm5 = vcmp.le.s32.totalorder (!%p259_p3), %v454_v10, %v450_v9 }
  0x10   : > { %s980_s16 = smov (!%p327_p5, %s844_s16), 1  ;;  %s982_s15 = smov (!%p329_p6, %s840_s15), 3 }
  0x11   : > { %s735_s22 = sshll.u32 %s980_s16, 2  ;;  %s741_s23 = sshll.u32 %s980_s16, 3  ;;  %v489_v38 = vld [vmem:[#allocation4] sm:$0xff] }
  0x12   : > { %s335_s24 = sadd.s32 %s735_s22, %s982_s15  ;;  %s368_s27 = scalar_lea.vmem %s967_s3, %s741_s23  ;;  %v465_v18 = vld [vmem:[#allocation2] sm:$0xff]  ;;  %v481_v32 = vld [vmem:[#allocation3] sm:$0xff] }
  0x13   : > { %s921_s28 = sshll.u32 %s335_s24, 2  ;;  %v447_v2 = vld [vmem:[%s368_s27] sm:$0xff] }
  0x14   : > { %s649_s5 = scalar_lea.vmem %s965_s1, %s921_s28  ;;  %vm448_vm2 = vcmp.gt.f32.partialorder %v447_v2, 0.5  ;;  %s337_s8 = scalar_lea.vmem %s964_s0, %s921_s28 }
  0x15   : > { %v744_v3 = vld [vmem:[%s649_s5 + $0x20] sm:$0xf]  ;;  %v458_v4 = vsel %vm448_vm2, 1, %v860_v1  ;;  %s655_s11 = scalar_lea.vmem %s966_s2, %s921_s28  ;;  %s379_s14 = scalar_lea.vmem %s968_s4, %s921_s28 }
  0x16   : > { %v405_v5 = vsel %vm388_vm0, %v744_v3, 0  ;;  %460 = vperm.xlu0 %810, %v458_v4   ;;  %v397_v6 = vld [vmem:[%s337_s8] sm:$0xf] }
  0x17   : > { %755 = vmatpush3.bf16.xpose.msra.mxu0 %v405_v5  ;;  %v745_v23 = vld [vmem:[%s655_s11 + $0x40] sm:$0xf] }
  0x18   : > { %v502_v24 = vsel %vm500_vm7, %v745_v23, 0 }
  0x19   : > { %761 = vmatpush3.bf16.msra.mxu1 %v502_v24 }
  0x1e   : > { %757 = vmatmul.mubr.msk.bf16.vlgmr.msra.gmra.mrb[0].mxu0 %vm388_vm0, %v397_v6 }
  0x95   : > { %v461_v11 = vpop.permute.xlu0 %460 }
  0x96   : > { %vm462_vm4 = vcmp.eq.s32.totalorder %v461_v11, 1 }
  0x97   : > { %vm463_vm6 = vmand %vm462_vm4, %vm457_vm5 }
  0xf1   : > { %v441_v12 = vpop.f32.mrb[0].mxu0 }
  0xf2   : > { %v464_v13 = vsel %vm463_vm6, %v441_v12, -1e+09  ;;  %v758_v14 = vpop.f32.mrb[1].mxu0 }
  0xf3   : > { %v444_v15 = vpop.f32.mrb[2].mxu0  ;;  %v466_v16 = vsel %vm388_vm0, %v464_v13, -inf }
  0xf4   : > { %467 = vmax.xlane.f32.xlu0 %v466_v16  ;;  %v759_v17 = vpop.f32.mrb[3].mxu0 }
 0x181   : > { %v468_v19 = vpop.xlane.xlu0 %467 }
 0x182   : > { %v469_v20 = vmax.f32 %v465_v18, %v468_v19 }
 0x184   : > { %v470_v21 = vsub.f32 %v465_v18, %v469_v20  ;;  %546 = vst.msk [vmem:[#allocation2] sm:$0xff] %vm385_vm3, %v469_v20  ;;  %475 = vperm.xlu1 %811, %v469_v20  }
 0x186   : > { %v471_v22 = vmul.f32 1.442695, %v470_v21 }
 0x188   : > { %812 = vpow2.f32 %v471_v22 }
 0x192   : > { %v813_v25 = vpop.eup %812 }
 0x193   : > { %492 = vperm.xlu0 %810, %v813_v25   ;;  %v482_v33 = vmul.f32 %v813_v25, %v481_v32 }
 0x203   : > { %v476_v26 = vpop.permute.xlu1 %475 }
 0x204   : > { %v478_v27 = vsub.f32 %v464_v13, %v476_v26 }
 0x206   : > { %v479_v28 = vmul.f32 1.442695, %v478_v27 }
 0x208   : > { %814 = vpow2.f32 %v479_v28 }
 0x212   : > { %v815_v29 = vpop.eup %814  ;;  %v493_v39 = vpop.permute.xlu0 %492 }
 0x213   : > { %v483_v30 = vsel %vm388_vm0, %v815_v29, 0.0  ;;  %v496_v31 = vpack.c.bf16 %v815_v29, %v815_v29  ;;  %v495_v40 = vmul.f32 %v493_v39, %v489_v38 }
 0x214   : > { %484 = vadd.xlane.f32.xlu1 %v483_v30 }
 0x215   : > { %763 = vmatmul.mubr.msk.bf16.vlgmr.msra.gmra.mrb[0].mxu1 %vm388_vm0, %v496_v31 }
 0x2a1   : > { %v485_v34 = vpop.xlane.xlu1 %484 }
 0x2a2   : > { %v486_v35 = vadd.f32 %v485_v34, %v482_v33 }
 0x2a4   : > { %488 = vst.msk [vmem:[#allocation3] sm:$0xff] %vm385_vm3, %v486_v35 }
 0x2ab   : > { %v551_v36 = vld [vmem:[#allocation3] sm:$0xff] }
 0x2ac   : > { %816 = vrcp.f32 %v551_v36 }
 0x2b6   : > { %v817_v37 = vpop.eup %816 }
 0x2b7   : > { %555 = vperm.xlu1 %811, %v817_v37  }
 0x2e8   : > { %v538_v41 = vpop.f32.mrb[0].mxu1 }
 0x2e9   : > { %v544_v42 = vadd.f32 %v538_v41, %v495_v40  ;;  %v764_v43 = vpop.f32.mrb[1].mxu1 }
 0x2ea   : > { %v541_v44 = vpop.f32.mrb[2].mxu1 }
 0x2eb   : > { %545 = vst.msk [vmem:[#allocation4] sm:$0xff] %vm388_vm0, %v544_v42  ;;  %v765_v45 = vpop.f32.mrb[3].mxu1 }
 0x2f2   : > { %v550_v46 = vld [vmem:[#allocation4] sm:$0xff] }
 0x336   : > { %v556_v47 = vpop.permute.xlu1 %555 }
 0x337   : > { %v558_v48 = vmul.f32 %v556_v47, %v550_v46 }
 0x339   : > { %v559_v49 = vpack.c.bf16 %v558_v48, %v558_v48 }
 0x33b   : > { %561 = vst.msk [vmem:[%s379_s14] sm:$0xf] %vm560_vm8, %v559_v49 }
 0x33c PF: > { %s14_s19 = sadd.s32 1, %s856_s19   ;;  %s969_s15 = smov %s848_s17 }
 0x33d   : > { %p11_p7 = scmp.ge.s32.totalorder %s14_s19, 10   ;;  %s970_s16 = smov %s852_s18 }
 0x33e   : > { %s971_s17 = smov %s974_s20  ;;  %s972_s18 = smov %s978_s21 }
 0x33f   :  { %13 = sbr.rel (!%p11_p7) target bundleno = 3 (0x3), region = 87 }

// kernel: transformer_forward.41
= control target key start
LH: loop header
LB: loop body
LE: loop exit
PB: predicated region body
PF: predicated region fallthrough
CT: control target
= control target key end

     0   :  { %vm28_vm0 = vcmask 261120   ;;  %v220_v0 = vmov 0.0   ;;  %vm221_vm1 = vmmov 0   ;;  %vm178_vm2 = vcmask 257024   ;;  %s293_s1 = inlined_call_operand.vmem [shape: bf16[32,32], index: 1, kind: input, shape index: {}]   ;;  %s294_s0 = inlined_call_operand.vmem [shape: bf16[16,32], index: 0, kind: input, shape index: {}]   ;;  %s295_s3 = inlined_call_operand.vmem [shape: bf16[16,32], index: 3, kind: input, shape index: {}]   ;;  %s296_s2 = inlined_call_operand.vmem [shape: f32[1,32], index: 2, kind: input, shape index: {}]   ;;  %s297_s4 = inlined_call_operand.vmem [shape: f32[1,32], index: 4, kind: input, shape index: {}]   ;;  %s298_s5 = inlined_call_operand.vmem [shape: f32[1,32], index: 5, kind: input, shape index: {}]   ;;  %s299_s6 = inlined_call_operand.vmem [shape: bf16[16,32], index: 6, kind: output, shape index: {}]  }
   0x1   :  { %203 = vmatprep.subr.bf16.mxu0 %v220_v0  ;;  %v213_v1 = vld [vmem:[%s293_s1] sm:$0xff]   ;;  %207 = vmatprep.mubr.msk.bf16.mxu0 %vm221_vm1, %v220_v0  ;;  %29 = vst.msk [vmem:[#allocation2] sm:$0xff] %vm28_vm0, %v220_v0  ;;  %30 = vst.msk [vmem:[#allocation2 + $0x8] sm:$0xff] %vm28_vm0, %v220_v0  ;;  %v214_v2 = vld [vmem:[%s293_s1 + $0x8] sm:$0xff]  }
   0x2   :  { %204 = vmatpush3.bf16.msra.mxu0 %v213_v1  ;;  %v215_v3 = vld [vmem:[%s294_s0] sm:$0xff]  }
   0x3   :  { %205 = vmatprep.subr.bf16.mxu0 %v220_v0  ;;  %v197_v12 = vld [vmem:[%s295_s3] sm:$0xff]  }
   0x4   :  { %v189_v13 = vld [vmem:[%s296_s2] ss:$0 sm:$0xff]  ;;  %v198_v14 = vunpack.c.l.bf16 %v197_v12  ;;  %v199_v17 = vunpack.c.h.bf16 %v197_v12 }
   0x5   :  { %v190_v41 = vld [vmem:[%s297_s4] ss:$0 sm:$0xff] }
   0x6   :  { %206 = vmatpush3.bf16.msra.mxu0 %v214_v2  ;;  %v191_v43 = vld [vmem:[%s298_s5] ss:$0 sm:$0xff] }
   0x8   :  { %v31_v4 = vld [vmem:[#allocation2] sm:$0xff]  ;;  %v32_v6 = vld [vmem:[#allocation2 + $0x8] sm:$0xff] }
   0x9   :  { %208 = vmatmul.mubr.msk.bf16.vlgmr.msra.gmra.mrb[0].mxu0 %vm28_vm0, %v215_v3 }
  0xdc   :  { %v94_v5 = vpop.f32.mrb[0].mxu0 }
  0xdd   :  { %v101_v7 = vadd.f32 %v94_v5, %v31_v4  ;;  %v209_v8 = vpop.f32.mrb[1].mxu0 }
  0xde   :  { %v97_v9 = vpop.f32.mrb[2].mxu0 }
  0xdf   :  { %103 = vst.msk [vmem:[#allocation2] sm:$0xff] %vm28_vm0, %v101_v7  ;;  %v102_v10 = vadd.f32 %v97_v9, %v32_v6  ;;  %v210_v11 = vpop.f32.mrb[3].mxu0 }
  0xe1   :  { %104 = vst.msk [vmem:[#allocation2 + $0x8] sm:$0xff] %vm28_vm0, %v102_v10 }
  0xe6   :  { %v108_v15 = vld [vmem:[#allocation2] sm:$0xff] }
  0xe7   :  { %v117_v16 = vadd.f32 %v189_v13, %v108_v15 }
  0xe8   :  { %v109_v18 = vld [vmem:[#allocation2 + $0x8] sm:$0xff] }
  0xe9   :  { %v123_v19 = vadd.f32 %v198_v14, %v117_v16  ;;  %v118_v20 = vadd.f32 %v189_v13, %v109_v18 }
  0xeb   :  { %v125_v21 = vsel %vm28_vm0, %v123_v19, 0.0  ;;  %v124_v22 = vadd.f32 %v199_v17, %v118_v20 }
  0xec   :  { %126 = vadd.xlane.f32.xlu0 %v125_v21 }
  0xed   :  { %v128_v23 = vsel %vm28_vm0, %v124_v22, 0.0 }
  0xf0   :  { %129 = vadd.xlane.f32.xlu0 %v128_v23 }
 0x179   :  { %v127_v24 = vpop.xlane.xlu0 %126 }
 0x17a   :  { %v132_v25 = vmul.f32 0.03125, %v127_v24 }
 0x17c   :  { %v134_v26 = vsub.f32 %v123_v19, %v132_v25 }
 0x17d   :  { %v130_v27 = vpop.xlane.xlu0 %129 }
 0x17e   :  { %v133_v28 = vmul.f32 0.03125, %v130_v27  ;;  %v136_v29 = vmul.f32 %v134_v26, %v134_v26 }
 0x180   :  { %v135_v30 = vsub.f32 %v124_v22, %v133_v28  ;;  %v138_v31 = vsel %vm28_vm0, %v136_v29, 0.0 }
 0x181   :  { %139 = vadd.xlane.f32.xlu1 %v138_v31 }
 0x182   :  { %v137_v32 = vmul.f32 %v135_v30, %v135_v30 }
 0x184   :  { %v141_v33 = vsel %vm28_vm0, %v137_v32, 0.0 }
 0x185   :  { %142 = vadd.xlane.f32.xlu1 %v141_v33 }
 0x20e   :  { %v140_v34 = vpop.xlane.xlu1 %139 }
 0x20f   :  { %v144_v35 = vmul.f32 0.03125, %v140_v34 }
 0x211   :  { %v146_v36 = vadd.f32 1e-05, %v144_v35 }
 0x212   :  { %v143_v37 = vpop.xlane.xlu1 %142 }
 0x213   :  { %216 = vrsqrt.f32 %v146_v36  ;;  %v145_v38 = vmul.f32 0.03125, %v143_v37 }
 0x215   :  { %v147_v39 = vadd.f32 1e-05, %v145_v38 }
 0x217   :  { %218 = vrsqrt.f32 %v147_v39 }
 0x21d   :  { %v217_v40 = vpop.eup %216 }
 0x21e   :  { %v150_v42 = vmul.f32 %v217_v40, %v134_v26 }
 0x220   :  { %v159_v44 = vmul.f32 %v190_v41, %v150_v42 }
 0x221   :  { %v219_v45 = vpop.eup %218 }
 0x222   :  { %v168_v46 = vadd.f32 %v191_v43, %v159_v44  ;;  %v151_v47 = vmul.f32 %v219_v45, %v135_v30 }
 0x224   :  { %v194_v48 = vpack.c.bf16 %v168_v46, %v168_v46  ;;  %v160_v49 = vmul.f32 %v190_v41, %v151_v47 }
 0x226   :  { %179 = vst.msk [vmem:[%s299_s6] sm:$0xf] %vm178_vm2, %v194_v48  ;;  %v169_v50 = vadd.f32 %v191_v43, %v160_v49 }
 0x228   :  { %v195_v51 = vpack.c.bf16 %v169_v50, %v169_v50 }
 0x22a   :  { %180 = vst.msk [vmem:[%s299_s6 + $0x4] sm:$0xf] %vm178_vm2, %v195_v51 }

// kernel: transformer_forward.32
= control target key start
LH: loop header
LB: loop body
LE: loop exit
PB: predicated region body
PF: predicated region fallthrough
CT: control target
= control target key end

     0   :  { %vm19_vm0 = vcmask 523264   ;;  %v153_v0 = vmov 0.0   ;;  %vm154_vm1 = vmmov 0   ;;  %vm47_vm2 = vcmask 261120   ;;  %s197_s1 = inlined_call_operand.vmem [shape: bf16[32,64], index: 1, kind: input, shape index: {}]   ;;  %s198_s0 = inlined_call_operand.vmem [shape: bf16[16,32], index: 0, kind: input, shape index: {}]   ;;  %s199_s2 = inlined_call_operand.vmem [shape: f32[1,64], index: 2, kind: input, shape index: {}]   ;;  %s200_s3 = inlined_call_operand.vmem [shape: bf16[16,64], index: 3, kind: output, shape index: {}]  }
   0x1   :  { %140 = vmatprep.subr.bf16.mxu0 %v153_v0  ;;  %v150_v1 = vld [vmem:[%s197_s1] sm:$0xff]   ;;  %144 = vmatprep.mubr.msk.bf16.mxu0 %vm154_vm1, %v153_v0  ;;  %20 = vst.msk [vmem:[#allocation2] sm:$0xff] %vm19_vm0, %v153_v0  ;;  %21 = vst.msk [vmem:[#allocation2 + $0x8] sm:$0xff] %vm19_vm0, %v153_v0  ;;  %v151_v2 = vld [vmem:[%s197_s1 + $0x8] sm:$0xff]   ;;  %vm121_vm3 = vcmask 519168  }
   0x2   :  { %141 = vmatpush3.bf16.msra.mxu0 %v150_v1  ;;  %v152_v3 = vld [vmem:[%s198_s0] sm:$0xff]  }
   0x3   :  { %142 = vmatprep.subr.bf16.mxu0 %v153_v0  ;;  %v132_v12 = vld [vmem:[%s199_s2] ss:$0 sm:$0xff] }
   0x6   :  { %143 = vmatpush3.bf16.msra.mxu0 %v151_v2 }
   0x8   :  { %v22_v4 = vld [vmem:[#allocation2] sm:$0xff]  ;;  %v23_v6 = vld [vmem:[#allocation2 + $0x8] sm:$0xff] }
   0x9   :  { %145 = vmatmul.mubr.msk.bf16.vlgmr.msra.gmra.mrb[0].mxu0 %vm47_vm2, %v152_v3 }
  0xdc   :  { %v85_v5 = vpop.f32.mrb[0].mxu0 }
  0xdd   :  { %v92_v7 = vadd.f32 %v85_v5, %v22_v4  ;;  %v146_v8 = vpop.f32.mrb[1].mxu0 }
  0xde   :  { %v88_v9 = vpop.f32.mrb[2].mxu0 }
  0xdf   :  { %95 = vst.msk [vmem:[#allocation2] sm:$0xff] %vm19_vm0, %v92_v7  ;;  %v93_v10 = vadd.f32 %v88_v9, %v23_v6  ;;  %v147_v11 = vpop.f32.mrb[3].mxu0 }
  0xe1   :  { %96 = vst.msk [vmem:[#allocation2 + $0x8] sm:$0xff] %vm19_vm0, %v93_v10 }
  0xe6   :  { %v100_v13 = vld [vmem:[#allocation2] sm:$0xff] }
  0xe7   :  { %v109_v14 = vadd.f32 %v132_v12, %v100_v13 }
  0xe8   :  { %v101_v15 = vld [vmem:[#allocation2 + $0x8] sm:$0xff] }
  0xe9   :  { %v111_v16 = vmax.f32 %v109_v14, 0.0  ;;  %v110_v17 = vadd.f32 %v132_v12, %v101_v15 }
  0xeb   :  { %v135_v18 = vpack.c.bf16 %v111_v16, %v111_v16  ;;  %v112_v19 = vmax.f32 %v110_v17, 0.0 }
  0xed   :  { %122 = vst.msk [vmem:[%s200_s3] sm:$0xf] %vm121_vm3, %v135_v18  ;;  %v136_v20 = vpack.c.bf16 %v112_v19, %v112_v19 }
  0xef   :  { %123 = vst.msk [vmem:[%s200_s3 + $0x4] sm:$0xf] %vm121_vm3, %v136_v20 }

// kernel: transformer_forward.43
= control target key start
LH: loop header
LB: loop body
LE: loop exit
PB: predicated region body
PF: predicated region fallthrough
CT: control target
= control target key end

     0   :  { %vm19_vm0 = vcmask 523264   ;;  %v151_v0 = vmov 0.0   ;;  %vm152_vm1 = vmmov 0   ;;  %vm47_vm2 = vcmask 261120   ;;  %s195_s1 = inlined_call_operand.vmem [shape: bf16[32,64], index: 1, kind: input, shape index: {}]   ;;  %s196_s0 = inlined_call_operand.vmem [shape: bf16[16,32], index: 0, kind: input, shape index: {}]   ;;  %s197_s2 = inlined_call_operand.vmem [shape: f32[1,64], index: 2, kind: input, shape index: {}]   ;;  %s198_s3 = inlined_call_operand.vmem [shape: bf16[16,64], index: 3, kind: output, shape index: {}]  }
   0x1   :  { %138 = vmatprep.subr.bf16.mxu0 %v151_v0  ;;  %v148_v1 = vld [vmem:[%s195_s1] sm:$0xff]   ;;  %142 = vmatprep.mubr.msk.bf16.mxu0 %vm152_vm1, %v151_v0  ;;  %20 = vst.msk [vmem:[#allocation2] sm:$0xff] %vm19_vm0, %v151_v0  ;;  %21 = vst.msk [vmem:[#allocation2 + $0x8] sm:$0xff] %vm19_vm0, %v151_v0  ;;  %v149_v2 = vld [vmem:[%s195_s1 + $0x8] sm:$0xff]   ;;  %vm119_vm3 = vcmask 519168  }
   0x2   :  { %139 = vmatpush3.bf16.msra.mxu0 %v148_v1  ;;  %v150_v3 = vld [vmem:[%s196_s0] sm:$0xff]  }
   0x3   :  { %140 = vmatprep.subr.bf16.mxu0 %v151_v0  ;;  %v130_v12 = vld [vmem:[%s197_s2] ss:$0 sm:$0xff] }
   0x6   :  { %141 = vmatpush3.bf16.msra.mxu0 %v149_v2 }
   0x8   :  { %v22_v4 = vld [vmem:[#allocation2] sm:$0xff]  ;;  %v23_v6 = vld [vmem:[#allocation2 + $0x8] sm:$0xff] }
   0x9   :  { %143 = vmatmul.mubr.msk.bf16.vlgmr.msra.gmra.mrb[0].mxu0 %vm47_vm2, %v150_v3 }
  0xdc   :  { %v85_v5 = vpop.f32.mrb[0].mxu0 }
  0xdd   :  { %v92_v7 = vadd.f32 %v85_v5, %v22_v4  ;;  %v144_v8 = vpop.f32.mrb[1].mxu0 }
  0xde   :  { %v88_v9 = vpop.f32.mrb[2].mxu0 }
  0xdf   :  { %95 = vst.msk [vmem:[#allocation2] sm:$0xff] %vm19_vm0, %v92_v7  ;;  %v93_v10 = vadd.f32 %v88_v9, %v23_v6  ;;  %v145_v11 = vpop.f32.mrb[3].mxu0 }
  0xe1   :  { %96 = vst.msk [vmem:[#allocation2 + $0x8] sm:$0xff] %vm19_vm0, %v93_v10 }
  0xe6   :  { %v100_v13 = vld [vmem:[#allocation2] sm:$0xff] }
  0xe7   :  { %v109_v14 = vadd.f32 %v130_v12, %v100_v13 }
  0xe8   :  { %v101_v15 = vld [vmem:[#allocation2 + $0x8] sm:$0xff] }
  0xe9   :  { %v133_v16 = vpack.c.bf16 %v109_v14, %v109_v14  ;;  %v110_v17 = vadd.f32 %v130_v12, %v101_v15 }
  0xeb   :  { %120 = vst.msk [vmem:[%s198_s3] sm:$0xf] %vm119_vm3, %v133_v16  ;;  %v134_v18 = vpack.c.bf16 %v110_v17, %v110_v17 }
  0xed   :  { %121 = vst.msk [vmem:[%s198_s3 + $0x4] sm:$0xf] %vm119_vm3, %v134_v18 }

// kernel: transformer_forward.30
= control target key start
LH: loop header
LB: loop body
LE: loop exit
PB: predicated region body
PF: predicated region fallthrough
CT: control target
= control target key end

     0   :  { %s864_s15 = smov 0   ;;  %s866_s16 = smov 0   ;;  %s941_s0 = inlined_call_operand.vmem [shape: bf16[3,2,4,8,8], index: 0, kind: input, shape index: {}, may-alias: {0,1,2}]   ;;  %s942_s1 = inlined_call_operand.vmem [shape: bf16[3,2,4,8,8], index: 1, kind: input, shape index: {}, may-alias: {0,1,2}]   ;;  %s943_s2 = inlined_call_operand.vmem [shape: bf16[3,2,4,8,8], index: 2, kind: input, shape index: {}, may-alias: {0,1,2}]   ;;  %s944_s3 = inlined_call_operand.vmem [shape: f32[2,1,8], index: 3, kind: input, shape index: {}]   ;;  %s945_s4 = inlined_call_operand.vmem [shape: bf16[2,4,8,8], index: 4, kind: output, shape index: {}]  }
   0x1   :  { %s868_s17 = smov 0   ;;  %s870_s18 = smov 0  }
   0x2   :  { %s872_s19 = smov 0  }
   0x3 LB: > { %s36_s20 = sadd.s32 1, %s825_s17  ;;  %s40_s21 = sadd.s32 1, %s829_s18  ;;  %s833_s19 = sphi %s872_s19, %s14_s19   ;;  %s829_s18 = sphi %s870_s18, %s949_s18   ;;  %s825_s17 = sphi %s868_s17, %s948_s17   ;;  %s821_s16 = sphi %s866_s16, %s947_s16   ;;  %s817_s15 = sphi %s864_s15, %s946_s15  }
   0x4   : > { %p38_p0 = scmp.ge.s32.totalorder %s36_s20, 4  ;;  %p712_p1 = scmp.ge.s32.totalorder %s833_s19, 1 }
   0x5   : > { %p257_p2 = scmp.lt.s32.totalorder %s833_s19, 9 }
   0x6   : > { %s951_s20 = smov (%p38_p0, %s36_s20), 0  ;;  %s953_s21 = smov (!%p38_p0, %s40_s21), %s829_s18 }
   0x7   : > { %p258_p3 = pnand %p712_p1, %p257_p2  ;;  %p42_p4 = scmp.ge.s32.totalorder %s953_s21, 2 }
   0x8   : > { %p325_p5 = scmp.lt.s32.totalorder (!%p258_p3), %s821_s16, 1  ;;  %p327_p6 = scmp.lt.s32.totalorder (!%p258_p3), %s817_s15, 3  ;;  %vm385_vm0 = vcmask (!%p258_p3), 64512   ;;  %v835_v0 = vmov (!%p258_p3), 0.0   ;;  %vm836_vm1 = vmmov (!%p258_p3), 0   ;;  %v837_v5 = vmov (!%p258_p3), 0  }
   0x9   : > { %s955_s21 = smov (%p42_p4, %s953_s21), 0  ;;  %261 = sbr.rel (%p258_p3) target bundleno = 828 (0x33c), region = 36 }
   0xa   : > { %731 = vmatprep.subr.bf16.mxu0 (!%p258_p3), %v835_v0  ;;  %386 = vst.msk [vmem:[#allocation4] sm:$0xff] (!%p258_p3), %vm385_vm0, %v835_v0  ;;  %733 = vmatprep.mubr.msk.bf16.mxu0 (!%p258_p3), %vm836_vm1, %v835_v0  ;;  %vm382_vm3 = vcmask (!%p258_p3), 7168   ;;  %v838_v7 = vmov (!%p258_p3), -1e+30   ;;  %v440_v8 = vlaneseq (!%p258_p3)  ;;  %vm481_vm5 = vcmask (!%p258_p3), 1043456  }
   0xb   : > { %737 = vmatprep.subr.bf16.mxu1 (!%p258_p3), %v835_v0  ;;  %739 = vmatprep.mubr.msk.bf16.mxu1 (!%p258_p3), %vm836_vm1, %v835_v0  ;;  %383 = vst.msk [vmem:[#allocation2] sm:$0xff] (!%p258_p3), %vm382_vm3, %v838_v7  ;;  %384 = vst.msk [vmem:[#allocation3] sm:$0xff] (!%p258_p3), %vm382_vm3, %v835_v0  ;;  %vm541_vm6 = vcmask (!%p258_p3), 60416  }
   0xc   : > { %787 = vset.pattern.permute.xlu0 (!%p258_p3), %v837_v5  ;;  %788 = vset.pattern.permute.xlu1 (!%p258_p3), %v837_v5  ;;  %v441_v9 = vshrl.u32 (!%p258_p3), %v440_v8, 7 }
   0xe   : > { %v442_v10 = vsub.s32 (!%p258_p3), 0, %v441_v9 }
  0x10   : > { %s957_s16 = smov (!%p325_p5, %s821_s16), 1  ;;  %s959_s15 = smov (!%p327_p6, %s817_s15), 3 }
  0x11   : > { %s713_s22 = sshll.u32 %s957_s16, 2  ;;  %s365_s7 = scalar_lea.vmem %s944_s3, %s957_s16  ;;  %v470_v38 = vld [vmem:[#allocation4] sm:$0xff] }
  0x12   : > { %s333_s23 = sadd.s32 %s713_s22, %s959_s15  ;;  %v437_v4 = vld [vmem:[%s365_s7] sm:$0x1]  ;;  %v462_v32 = vld [vmem:[#allocation3] sm:$0xff] }
  0x13   : > { %s895_s24 = sshll.u32 %s333_s23, 2  ;;  %vm438_vm2 = vcmp.gt.f32.partialorder %v437_v4, 0.5  ;;  %v446_v18 = vld [vmem:[#allocation2] sm:$0xff] }
  0x14   : > { %s628_s27 = scalar_lea.vmem %s942_s1, %s895_s24  ;;  %s335_s30 = scalar_lea.vmem %s941_s0, %s895_s24  ;;  %v439_v6 = vsel %vm438_vm2, 1, %v837_v5 }
  0x15   : > { %v721_v1 = vld [vmem:[%s628_s27 + $0x20] sm:$0xf]  ;;  %v443_v11 = vrot.slane %v439_v6, %v442_v10  ;;  %s634_s10 = scalar_lea.vmem %s943_s2, %s895_s24  ;;  %s376_s13 = scalar_lea.vmem %s945_s4, %s895_s24 }
  0x16   : > { %v395_v2 = vsel %vm385_vm0, %v721_v1, 0  ;;  %v387_v3 = vld [vmem:[%s335_s30] sm:$0xf] }
  0x17   : > { %732 = vmatpush3.bf16.xpose.msra.mxu0 %v395_v2  ;;  %vm444_vm4 = vcmp.eq.s32.totalorder %v443_v11, 1  ;;  %v722_v22 = vld [vmem:[%s634_s10 + $0x40] sm:$0xf] }
  0x18   : > { %v483_v23 = vsel %vm481_vm5, %v722_v22, 0 }
  0x19   : > { %738 = vmatpush3.bf16.msra.mxu1 %v483_v23 }
  0x1e   : > { %734 = vmatmul.mubr.msk.bf16.vlgmr.msra.gmra.mrb[0].mxu0 %vm385_vm0, %v387_v3 }
  0xf1   : > { %v431_v12 = vpop.f32.mrb[0].mxu0 }
  0xf2   : > { %v445_v13 = vsel %vm444_vm4, %v431_v12, -1e+09  ;;  %v735_v14 = vpop.f32.mrb[1].mxu0 }
  0xf3   : > { %v434_v15 = vpop.f32.mrb[2].mxu0  ;;  %v447_v16 = vsel %vm385_vm0, %v445_v13, -inf }
  0xf4   : > { %448 = vmax.xlane.f32.xlu0 %v447_v16  ;;  %v736_v17 = vpop.f32.mrb[3].mxu0 }
 0x181   : > { %v449_v19 = vpop.xlane.xlu0 %448 }
 0x182   : > { %v450_v20 = vmax.f32 %v446_v18, %v449_v19 }
 0x184   : > { %v451_v21 = vsub.f32 %v446_v18, %v450_v20  ;;  %527 = vst.msk [vmem:[#allocation2] sm:$0xff] %vm382_vm3, %v450_v20  ;;  %456 = vperm.xlu0 %787, %v450_v20  }
 0x186   : > { %v452_v30 = vmul.f32 1.442695, %v451_v21 }
 0x203   : > { %v457_v24 = vpop.permute.xlu0 %456 }
 0x204   : > { %v459_v25 = vsub.f32 %v445_v13, %v457_v24 }
 0x206   : > { %v460_v26 = vmul.f32 1.442695, %v459_v25 }
 0x208   : > { %789 = vpow2.f32 %v460_v26 }
 0x209   : > { %791 = vpow2.f32 %v452_v30 }
 0x212   : > { %v790_v27 = vpop.eup %789 }
 0x213   : > { %v464_v28 = vsel %vm385_vm0, %v790_v27, 0.0  ;;  %v477_v29 = vpack.c.bf16 %v790_v27, %v790_v27  ;;  %v792_v31 = vpop.eup %791 }
 0x214   : > { %465 = vadd.xlane.f32.xlu1 %v464_v28  ;;  %v463_v33 = vmul.f32 %v792_v31, %v462_v32 }
 0x215   : > { %740 = vmatmul.mubr.msk.bf16.vlgmr.msra.gmra.mrb[0].mxu1 %vm385_vm0, %v477_v29 }
 0x225   : > { %473 = vperm.xlu1 %788, %v792_v31  }
 0x2a1   : > { %v466_v34 = vpop.xlane.xlu1 %465 }
 0x2a2   : > { %v467_v35 = vadd.f32 %v466_v34, %v463_v33 }
 0x2a4   : > { %469 = vst.msk [vmem:[#allocation3] sm:$0xff] %vm382_vm3, %v467_v35 }
 0x2a5   : > { %v474_v39 = vpop.permute.xlu1 %473 }
 0x2a6   : > { %v476_v40 = vmul.f32 %v474_v39, %v470_v38 }
 0x2ab   : > { %v532_v36 = vld [vmem:[#allocation3] sm:$0xff] }
 0x2ac   : > { %793 = vrcp.f32 %v532_v36 }
 0x2b6   : > { %v794_v37 = vpop.eup %793 }
 0x2b7   : > { %536 = vperm.xlu1 %788, %v794_v37  }
 0x2e8   : > { %v519_v41 = vpop.f32.mrb[0].mxu1 }
 0x2e9   : > { %v525_v42 = vadd.f32 %v519_v41, %v476_v40  ;;  %v741_v43 = vpop.f32.mrb[1].mxu1 }
 0x2ea   : > { %v522_v44 = vpop.f32.mrb[2].mxu1 }
 0x2eb   : > { %526 = vst.msk [vmem:[#allocation4] sm:$0xff] %vm385_vm0, %v525_v42  ;;  %v742_v45 = vpop.f32.mrb[3].mxu1 }
 0x2f2   : > { %v531_v46 = vld [vmem:[#allocation4] sm:$0xff] }
 0x336   : > { %v537_v47 = vpop.permute.xlu1 %536 }
 0x337   : > { %v539_v48 = vmul.f32 %v537_v47, %v531_v46 }
 0x339   : > { %v540_v49 = vpack.c.bf16 %v539_v48, %v539_v48 }
 0x33b   : > { %542 = vst.msk [vmem:[%s376_s13] sm:$0xf] %vm541_vm6, %v540_v49 }
 0x33c PF: > { %s14_s19 = sadd.s32 1, %s833_s19   ;;  %s946_s15 = smov %s825_s17 }
 0x33d   : > { %p11_p7 = scmp.ge.s32.totalorder %s14_s19, 10   ;;  %s947_s16 = smov %s829_s18 }
 0x33e   : > { %s948_s17 = smov %s951_s20  ;;  %s949_s18 = smov %s955_s21 }
 0x33f   :  { %13 = sbr.rel (!%p11_p7) target bundleno = 3 (0x3), region = 83 }

// kernel: transformer_forward.33
= control target key start
LH: loop header
LB: loop body
LE: loop exit
PB: predicated region body
PF: predicated region fallthrough
CT: control target
= control target key end

     0   :  { %vm28_vm0 = vcmask 261120   ;;  %v247_v0 = vmov 0.0   ;;  %vm248_vm1 = vmmov 0   ;;  %vm72_vm2 = vcmask 523264   ;;  %s325_s1 = inlined_call_operand.vmem [shape: bf16[64,32], index: 1, kind: input, shape index: {}]   ;;  %s326_s0 = inlined_call_operand.vmem [shape: bf16[16,64], index: 0, kind: input, shape index: {}]   ;;  %s327_s3 = inlined_call_operand.vmem [shape: bf16[16,32], index: 3, kind: input, shape index: {}]   ;;  %s328_s2 = inlined_call_operand.vmem [shape: f32[1,32], index: 2, kind: input, shape index: {}]   ;;  %s329_s4 = inlined_call_operand.vmem [shape: f32[1,32], index: 4, kind: input, shape index: {}]   ;;  %s330_s5 = inlined_call_operand.vmem [shape: f32[1,32], index: 5, kind: input, shape index: {}]   ;;  %s331_s6 = inlined_call_operand.vmem [shape: bf16[16,32], index: 6, kind: output, shape index: {}]  }
   0x1   :  { %224 = vmatprep.subr.bf16.mxu0 %v247_v0  ;;  %v238_v1 = vld [vmem:[%s325_s1] sm:$0xff]   ;;  %232 = vmatprep.mubr.msk.bf16.mxu0 %vm248_vm1, %v247_v0  ;;  %29 = vst.msk [vmem:[#allocation2] sm:$0xff] %vm28_vm0, %v247_v0  ;;  %30 = vst.msk [vmem:[#allocation2 + $0x8] sm:$0xff] %vm28_vm0, %v247_v0  ;;  %v239_v2 = vld [vmem:[%s325_s1 + $0x8] sm:$0xff]   ;;  %vm195_vm3 = vcmask 257024  }
   0x2   :  { %225 = vmatpush3.bf16.msra.mxu0 %v238_v1  ;;  %v240_v3 = vld [vmem:[%s325_s1 + $0x10] sm:$0xff]   ;;  %v241_v4 = vld [vmem:[%s325_s1 + $0x18] sm:$0xff]   ;;  %v242_v5 = vld [vmem:[%s326_s0] sm:$0xff]  }
   0x3   :  { %226 = vmatprep.subr.bf16.mxu0 %v247_v0  ;;  %v216_v14 = vld [vmem:[%s327_s3] sm:$0xff]  }
   0x4   :  { %v208_v15 = vld [vmem:[%s328_s2] ss:$0 sm:$0xff]  ;;  %v217_v16 = vunpack.c.l.bf16 %v216_v14  ;;  %v218_v19 = vunpack.c.h.bf16 %v216_v14 }
   0x5   :  { %v209_v43 = vld [vmem:[%s329_s4] ss:$0 sm:$0xff] }
   0x6   :  { %227 = vmatpush3.bf16.msra.mxu0 %v239_v2  ;;  %v210_v45 = vld [vmem:[%s330_s5] ss:$0 sm:$0xff] }
   0x7   :  { %228 = vmatprep.subr.bf16.mxu0 %v247_v0 }
   0x8   :  { %v31_v6 = vld [vmem:[#allocation2] sm:$0xff]  ;;  %v32_v8 = vld [vmem:[#allocation2 + $0x8] sm:$0xff] }
   0xa   :  { %229 = vmatpush3.bf16.msra.mxu0 %v240_v3 }
   0xb   :  { %230 = vmatprep.subr.bf16.mxu0 %v247_v0 }
   0xe   :  { %231 = vmatpush3.bf16.msra.mxu0 %v241_v4 }
  0x11   :  { %233 = vmatmul.mubr.msk.bf16.vlgmr.msra.gmra.mrb[0].mxu0 %vm72_vm2, %v242_v5 }
  0xe4   :  { %v110_v7 = vpop.f32.mrb[0].mxu0 }
  0xe5   :  { %v117_v9 = vadd.f32 %v110_v7, %v31_v6  ;;  %v234_v10 = vpop.f32.mrb[1].mxu0 }
  0xe6   :  { %v113_v11 = vpop.f32.mrb[2].mxu0 }
  0xe7   :  { %120 = vst.msk [vmem:[#allocation2] sm:$0xff] %vm28_vm0, %v117_v9  ;;  %v118_v12 = vadd.f32 %v113_v11, %v32_v8  ;;  %v235_v13 = vpop.f32.mrb[3].mxu0 }
  0xe9   :  { %121 = vst.msk [vmem:[#allocation2 + $0x8] sm:$0xff] %vm28_vm0, %v118_v12 }
  0xee   :  { %v125_v17 = vld [vmem:[#allocation2] sm:$0xff] }
  0xef   :  { %v134_v18 = vadd.f32 %v208_v15, %v125_v17 }
  0xf0   :  { %v126_v20 = vld [vmem:[#allocation2 + $0x8] sm:$0xff] }
  0xf1   :  { %v140_v21 = vadd.f32 %v217_v16, %v134_v18  ;;  %v135_v22 = vadd.f32 %v208_v15, %v126_v20 }
  0xf3   :  { %v142_v23 = vsel %vm28_vm0, %v140_v21, 0.0  ;;  %v141_v24 = vadd.f32 %v218_v19, %v135_v22 }
  0xf4   :  { %143 = vadd.xlane.f32.xlu0 %v142_v23 }
  0xf5   :  { %v145_v25 = vsel %vm28_vm0, %v141_v24, 0.0 }
  0xf8   :  { %146 = vadd.xlane.f32.xlu0 %v145_v25 }
 0x181   :  { %v144_v26 = vpop.xlane.xlu0 %143 }
 0x182   :  { %v149_v27 = vmul.f32 0.03125, %v144_v26 }
 0x184   :  { %v151_v28 = vsub.f32 %v140_v21, %v149_v27 }
 0x185   :  { %v147_v29 = vpop.xlane.xlu0 %146 }
 0x186   :  { %v150_v30 = vmul.f32 0.03125, %v147_v29  ;;  %v153_v31 = vmul.f32 %v151_v28, %v151_v28 }
 0x188   :  { %v152_v32 = vsub.f32 %v141_v24, %v150_v30  ;;  %v155_v33 = vsel %vm28_vm0, %v153_v31, 0.0 }
 0x189   :  { %156 = vadd.xlane.f32.xlu1 %v155_v33 }
 0x18a   :  { %v154_v34 = vmul.f32 %v152_v32, %v152_v32 }
 0x18c   :  { %v158_v35 = vsel %vm28_vm0, %v154_v34, 0.0 }
 0x18d   :  { %159 = vadd.xlane.f32.xlu1 %v158_v35 }
 0x216   :  { %v157_v36 = vpop.xlane.xlu1 %156 }
 0x217   :  { %v161_v37 = vmul.f32 0.03125, %v157_v36 }
 0x219   :  { %v163_v38 = vadd.f32 1e-05, %v161_v37 }
 0x21a   :  { %v160_v39 = vpop.xlane.xlu1 %159 }
 0x21b   :  { %243 = vrsqrt.f32 %v163_v38  ;;  %v162_v40 = vmul.f32 0.03125, %v160_v39 }
 0x21d   :  { %v164_v41 = vadd.f32 1e-05, %v162_v40 }
 0x21f   :  { %245 = vrsqrt.f32 %v164_v41 }
 0x225   :  { %v244_v42 = vpop.eup %243 }
 0x226   :  { %v167_v44 = vmul.f32 %v244_v42, %v151_v28 }
 0x228   :  { %v176_v46 = vmul.f32 %v209_v43, %v167_v44 }
 0x229   :  { %v246_v47 = vpop.eup %245 }
 0x22a   :  { %v185_v48 = vadd.f32 %v210_v45, %v176_v46  ;;  %v168_v49 = vmul.f32 %v246_v47, %v152_v32 }
 0x22c   :  { %v213_v50 = vpack.c.bf16 %v185_v48, %v185_v48  ;;  %v177_v51 = vmul.f32 %v209_v43, %v168_v49 }
 0x22e   :  { %196 = vst.msk [vmem:[%s331_s6] sm:$0xf] %vm195_vm3, %v213_v50  ;;  %v186_v52 = vadd.f32 %v210_v45, %v177_v51 }
 0x230   :  { %v214_v53 = vpack.c.bf16 %v186_v52, %v186_v52 }
 0x232   :  { %197 = vst.msk [vmem:[%s331_s6 + $0x4] sm:$0xf] %vm195_vm3, %v214_v53 }

// kernel: transformer_forward.57
= control target key start
LH: loop header
LB: loop body
LE: loop exit
PB: predicated region body
PF: predicated region fallthrough
CT: control target
= control target key end

     0   :  { %v178_v1 = vmov 0.0   ;;  %vm179_vm0 = vmmov 0   ;;  %vm20_vm1 = vcmask 130048   ;;  %s233_s0 = inlined_call_operand.vmem [shape: bf16[16,32], index: 0, kind: input, shape index: {}]   ;;  %s234_s1 = inlined_call_operand.vmem [shape: bf16[32,16], index: 1, kind: input, shape index: {}]   ;;  %s235_s2 = inlined_call_operand.vmem [shape: f32[1,16], index: 2, kind: input, shape index: {}]   ;;  %s236_s3 = inlined_call_operand.hbm [shape: f32[16,16], index: 3, kind: output, shape index: {}]  }
   0x1   :  { %v151_v0 = vld [vmem:[%s234_s1] sm:$0xff]   ;;  %138 = vmatprep.subr.bf16.mxu0 %v178_v1  ;;  %v152_v2 = vld [vmem:[%s234_s1 + $0x8] sm:$0xff]   ;;  %142 = vmatprep.mubr.msk.bf16.mxu0 %vm179_vm0, %v178_v1 }
   0x2   :  { %139 = vmatpush3.bf16.msra.mxu0 %v151_v0 }
   0x3   :  { %140 = vmatprep.subr.bf16.mxu0 %v178_v1 }
   0x4   :  { %8 = vsyncpa [#allocation4], 0  ;;  %21 = vst.msk [vmem:[#allocation2] sm:$0xff] %vm20_vm1, %v178_v1  ;;  %v153_v3 = vld [vmem:[%s233_s0] sm:$0xff]   ;;  %vm48_vm2 = vcmask 261120   ;;  %s180_s0 = smov [#allocation3]  }
   0x5   :  { %22 = vst.msk [vmem:[#allocation2 + $0x8] sm:$0xff] %vm20_vm1, %v178_v1  ;;  %v134_v12 = vld [vmem:[%s235_s2] ss:$0 sm:$0xff]  ;;  %s119_s19 = sshll.u32 %s180_s0, 4  ;;  %s120_s19 = int_to_ptr.vmem [resolvable:$true] %s119_s19 }
   0x6   :  { %141 = vmatpush3.bf16.msra.mxu0 %v152_v2  ;;  %s154_s20 = scalar_lea.vmem %s120_s19, 256  ;;  %p159_p1 = scmp.lt.s32.totalorder %s120_s19, %s120_s19 }
   0x7   :  { %p155_p0 = scmp.ne.s32.totalorder %s120_s19, %s154_s20  ;;  %p160_p2 = scmp.lt.s32.totalorder %s154_s20, %s154_s20 }
   0x9   :  { %143 = vmatmul.mubr.msk.bf16.vlgmr.msra.gmra.mrb[0].mxu0 %vm48_vm2, %v153_v3  ;;  %p161_p3 = por %p160_p2, %p159_p1 }
   0xb   :  { %v23_v4 = vld [vmem:[#allocation2] sm:$0xff]  ;;  %p162_p4 = pnand %p161_p3, %p155_p0 }
   0xc   :  { %v24_v6 = vld [vmem:[#allocation2 + $0x8] sm:$0xff] }
  0xdc   :  { %v86_v5 = vpop.f32.mrb[0].mxu0 }
  0xdd   :  { %v93_v7 = vadd.f32 %v86_v5, %v23_v4  ;;  %v144_v8 = vpop.f32.mrb[1].mxu0 }
  0xde   :  { %v89_v9 = vpop.f32.mrb[2].mxu0 }
  0xdf   :  { %96 = vst.msk [vmem:[#allocation2] sm:$0xff] %vm20_vm1, %v93_v7  ;;  %v94_v10 = vadd.f32 %v89_v9, %v24_v6  ;;  %v145_v11 = vpop.f32.mrb[3].mxu0 }
  0xe1   :  { %97 = vst.msk [vmem:[#allocation2 + $0x8] sm:$0xff] %vm20_vm1, %v94_v10 }
  0xe6   :  { %v101_v13 = vld [vmem:[#allocation2] sm:$0xff] }
  0xe7   :  { %v110_v14 = vadd.f32 %v134_v12, %v101_v13 }
  0xe8   :  { %v102_v15 = vld [vmem:[#allocation2 + $0x8] sm:$0xff] }
  0xe9   :  { %v111_v16 = vadd.f32 %v134_v12, %v102_v15  ;;  %112 = vst.msk [vmem:[#allocation3] sm:$0xff] %vm20_vm1, %v110_v14 }
  0xeb   :  { %113 = vst.msk [vmem:[#allocation3 + $0x8] sm:$0xff] %vm20_vm1, %v111_v16 }
  0xec   :  { %165 = shalt.err (!%p162_p4)
}
  0xed   :  { %s166_s22 = scalar_lea.hbm %s236_s3, 256 }
  0xee   :  { %p167_p5 = scmp.ne.s32.totalorder %s236_s3, %s166_s22  ;;  %p170_p6 = scmp.lt.u32.totalorder %s166_s22, %s236_s3 }
  0xf0   :  { %p172_p7 = pnand %p170_p6, %p167_p5 }
  0xf2   :  { %175 = shalt.err (!%p172_p7)
}
  0xf3   :  { %s181_s27 = smov 128   ;;  %s182_s28 = smov 8  }
  0xf4   :  { %125 = dma.vmem_to_hbm [thread:$0]  %s120_s19, 256, %s236_s3, [#allocation4], %s181_s27, %s181_s27, %s182_s28  }
  0xf5   :  { %176 = dma.done.wait [#allocation4], 256  }
  0xf6   :  { %177 = vsyncadd [#allocation4], 4294967040 }
  0xf7   :  { %129 = vsyncpa [#allocation4], 1 }

// kernel: transformer_forward.44
= control target key start
LH: loop header
LB: loop body
LE: loop exit
PB: predicated region body
PF: predicated region fallthrough
CT: control target
= control target key end

     0   :  { %s857_s15 = smov 0   ;;  %s859_s16 = smov 0   ;;  %s934_s0 = inlined_call_operand.vmem [shape: bf16[1,2,4,8,8], index: 0, kind: input, shape index: {}]   ;;  %s935_s1 = inlined_call_operand.vmem [shape: bf16[2,2,4,8,8], index: 1, kind: input, shape index: {}, may-alias: {1,2}]   ;;  %s936_s2 = inlined_call_operand.vmem [shape: bf16[2,2,4,8,8], index: 2, kind: input, shape index: {}, may-alias: {1,2}]   ;;  %s937_s3 = inlined_call_operand.vmem [shape: f32[2,1,8], index: 3, kind: input, shape index: {}]   ;;  %s938_s4 = inlined_call_operand.vmem [shape: bf16[2,4,8,8], index: 4, kind: output, shape index: {}]  }
   0x1   :  { %s861_s17 = smov 0   ;;  %s863_s18 = smov 0  }
   0x2   :  { %s865_s19 = smov 0  }
   0x3 LB: > { %s36_s20 = sadd.s32 1, %s818_s17  ;;  %s40_s21 = sadd.s32 1, %s822_s18  ;;  %s826_s19 = sphi %s865_s19, %s14_s19   ;;  %s822_s18 = sphi %s863_s18, %s942_s18   ;;  %s818_s17 = sphi %s861_s17, %s941_s17   ;;  %s814_s16 = sphi %s859_s16, %s940_s16   ;;  %s810_s15 = sphi %s857_s15, %s939_s15  }
   0x4   : > { %p38_p0 = scmp.ge.s32.totalorder %s36_s20, 4  ;;  %p706_p1 = scmp.ge.s32.totalorder %s826_s19, 1 }
   0x5   : > { %p256_p2 = scmp.lt.s32.totalorder %s826_s19, 9 }
   0x6   : > { %s944_s20 = smov (%p38_p0, %s36_s20), 0  ;;  %s946_s21 = smov (!%p38_p0, %s40_s21), %s822_s18 }
   0x7   : > { %p257_p3 = pnand %p706_p1, %p256_p2  ;;  %p42_p4 = scmp.ge.s32.totalorder %s946_s21, 2 }
   0x8   : > { %p323_p5 = scmp.lt.s32.totalorder (!%p257_p3), %s814_s16, 1  ;;  %p325_p6 = scmp.lt.s32.totalorder (!%p257_p3), %s810_s15, 3  ;;  %vm382_vm0 = vcmask (!%p257_p3), 64512   ;;  %v828_v0 = vmov (!%p257_p3), 0.0   ;;  %vm829_vm1 = vmmov (!%p257_p3), 0   ;;  %v830_v5 = vmov (!%p257_p3), 0  }
   0x9   : > { %s948_s21 = smov (%p42_p4, %s946_s21), 0  ;;  %260 = sbr.rel (%p257_p3) target bundleno = 828 (0x33c), region = 36 }
   0xa   : > { %724 = vmatprep.subr.bf16.mxu0 (!%p257_p3), %v828_v0  ;;  %383 = vst.msk [vmem:[#allocation4] sm:$0xff] (!%p257_p3), %vm382_vm0, %v828_v0  ;;  %726 = vmatprep.mubr.msk.bf16.mxu0 (!%p257_p3), %vm829_vm1, %v828_v0  ;;  %vm379_vm3 = vcmask (!%p257_p3), 7168   ;;  %v831_v7 = vmov (!%p257_p3), -1e+30   ;;  %v437_v8 = vlaneseq (!%p257_p3)  ;;  %vm478_vm5 = vcmask (!%p257_p3), 1043456  }
   0xb   : > { %730 = vmatprep.subr.bf16.mxu1 (!%p257_p3), %v828_v0  ;;  %732 = vmatprep.mubr.msk.bf16.mxu1 (!%p257_p3), %vm829_vm1, %v828_v0  ;;  %380 = vst.msk [vmem:[#allocation2] sm:$0xff] (!%p257_p3), %vm379_vm3, %v831_v7  ;;  %381 = vst.msk [vmem:[#allocation3] sm:$0xff] (!%p257_p3), %vm379_vm3, %v828_v0  ;;  %vm538_vm6 = vcmask (!%p257_p3), 60416  }
   0xc   : > { %780 = vset.pattern.permute.xlu0 (!%p257_p3), %v830_v5  ;;  %781 = vset.pattern.permute.xlu1 (!%p257_p3), %v830_v5  ;;  %v438_v9 = vshrl.u32 (!%p257_p3), %v437_v8, 7 }
   0xe   : > { %v439_v10 = vsub.s32 (!%p257_p3), 0, %v438_v9 }
  0x10   : > { %s950_s16 = smov (!%p323_p5, %s814_s16), 1  ;;  %s952_s15 = smov (!%p325_p6, %s810_s15), 3 }
  0x11   : > { %s707_s22 = sshll.u32 %s950_s16, 2  ;;  %s362_s7 = scalar_lea.vmem %s937_s3, %s950_s16  ;;  %v467_v38 = vld [vmem:[#allocation4] sm:$0xff] }
  0x12   : > { %s331_s23 = sadd.s32 %s707_s22, %s952_s15  ;;  %v434_v4 = vld [vmem:[%s362_s7] sm:$0x1]  ;;  %v459_v32 = vld [vmem:[#allocation3] sm:$0xff] }
  0x13   : > { %s888_s24 = sshll.u32 %s331_s23, 2  ;;  %vm435_vm2 = vcmp.gt.f32.partialorder %v434_v4, 0.5  ;;  %v443_v18 = vld [vmem:[#allocation2] sm:$0xff] }
  0x14   : > { %s344_s27 = scalar_lea.vmem %s935_s1, %s888_s24  ;;  %s333_s30 = scalar_lea.vmem %s934_s0, %s888_s24  ;;  %v436_v6 = vsel %vm435_vm2, 1, %v830_v5 }
  0x15   : > { %v385_v1 = vld [vmem:[%s344_s27] sm:$0xf]  ;;  %v440_v11 = vrot.slane %v436_v6, %v439_v10  ;;  %s628_s10 = scalar_lea.vmem %s936_s2, %s888_s24  ;;  %s373_s13 = scalar_lea.vmem %s938_s4, %s888_s24 }
  0x16   : > { %v392_v2 = vsel %vm382_vm0, %v385_v1, 0  ;;  %v384_v3 = vld [vmem:[%s333_s30] sm:$0xf] }
  0x17   : > { %725 = vmatpush3.bf16.xpose.msra.mxu0 %v392_v2  ;;  %vm441_vm4 = vcmp.eq.s32.totalorder %v440_v11, 1  ;;  %v715_v22 = vld [vmem:[%s628_s10 + $0x20] sm:$0xf] }
  0x18   : > { %v480_v23 = vsel %vm478_vm5, %v715_v22, 0 }
  0x19   : > { %731 = vmatpush3.bf16.msra.mxu1 %v480_v23 }
  0x1e   : > { %727 = vmatmul.mubr.msk.bf16.vlgmr.msra.gmra.mrb[0].mxu0 %vm382_vm0, %v384_v3 }
  0xf1   : > { %v428_v12 = vpop.f32.mrb[0].mxu0 }
  0xf2   : > { %v442_v13 = vsel %vm441_vm4, %v428_v12, -1e+09  ;;  %v728_v14 = vpop.f32.mrb[1].mxu0 }
  0xf3   : > { %v431_v15 = vpop.f32.mrb[2].mxu0  ;;  %v444_v16 = vsel %vm382_vm0, %v442_v13, -inf }
  0xf4   : > { %445 = vmax.xlane.f32.xlu0 %v444_v16  ;;  %v729_v17 = vpop.f32.mrb[3].mxu0 }
 0x181   : > { %v446_v19 = vpop.xlane.xlu0 %445 }
 0x182   : > { %v447_v20 = vmax.f32 %v443_v18, %v446_v19 }
 0x184   : > { %v448_v21 = vsub.f32 %v443_v18, %v447_v20  ;;  %524 = vst.msk [vmem:[#allocation2] sm:$0xff] %vm379_vm3, %v447_v20  ;;  %453 = vperm.xlu0 %780, %v447_v20  }
 0x186   : > { %v449_v30 = vmul.f32 1.442695, %v448_v21 }
 0x203   : > { %v454_v24 = vpop.permute.xlu0 %453 }
 0x204   : > { %v456_v25 = vsub.f32 %v442_v13, %v454_v24 }
 0x206   : > { %v457_v26 = vmul.f32 1.442695, %v456_v25 }
 0x208   : > { %782 = vpow2.f32 %v457_v26 }
 0x209   : > { %784 = vpow2.f32 %v449_v30 }
 0x212   : > { %v783_v27 = vpop.eup %782 }
 0x213   : > { %v461_v28 = vsel %vm382_vm0, %v783_v27, 0.0  ;;  %v474_v29 = vpack.c.bf16 %v783_v27, %v783_v27  ;;  %v785_v31 = vpop.eup %784 }
 0x214   : > { %462 = vadd.xlane.f32.xlu1 %v461_v28  ;;  %v460_v33 = vmul.f32 %v785_v31, %v459_v32 }
 0x215   : > { %733 = vmatmul.mubr.msk.bf16.vlgmr.msra.gmra.mrb[0].mxu1 %vm382_vm0, %v474_v29 }
 0x225   : > { %470 = vperm.xlu1 %781, %v785_v31  }
 0x2a1   : > { %v463_v34 = vpop.xlane.xlu1 %462 }
 0x2a2   : > { %v464_v35 = vadd.f32 %v463_v34, %v460_v33 }
 0x2a4   : > { %466 = vst.msk [vmem:[#allocation3] sm:$0xff] %vm379_vm3, %v464_v35 }
 0x2a5   : > { %v471_v39 = vpop.permute.xlu1 %470 }
 0x2a6   : > { %v473_v40 = vmul.f32 %v471_v39, %v467_v38 }
 0x2ab   : > { %v529_v36 = vld [vmem:[#allocation3] sm:$0xff] }
 0x2ac   : > { %786 = vrcp.f32 %v529_v36 }
 0x2b6   : > { %v787_v37 = vpop.eup %786 }
 0x2b7   : > { %533 = vperm.xlu1 %781, %v787_v37  }
 0x2e8   : > { %v516_v41 = vpop.f32.mrb[0].mxu1 }
 0x2e9   : > { %v522_v42 = vadd.f32 %v516_v41, %v473_v40  ;;  %v734_v43 = vpop.f32.mrb[1].mxu1 }
 0x2ea   : > { %v519_v44 = vpop.f32.mrb[2].mxu1 }
 0x2eb   : > { %523 = vst.msk [vmem:[#allocation4] sm:$0xff] %vm382_vm0, %v522_v42  ;;  %v735_v45 = vpop.f32.mrb[3].mxu1 }
 0x2f2   : > { %v528_v46 = vld [vmem:[#allocation4] sm:$0xff] }
 0x336   : > { %v534_v47 = vpop.permute.xlu1 %533 }
 0x337   : > { %v536_v48 = vmul.f32 %v534_v47, %v528_v46 }
 0x339   : > { %v537_v49 = vpack.c.bf16 %v536_v48, %v536_v48 }
 0x33b   : > { %539 = vst.msk [vmem:[%s373_s13] sm:$0xf] %vm538_vm6, %v537_v49 }
 0x33c PF: > { %s14_s19 = sadd.s32 1, %s826_s19   ;;  %s939_s15 = smov %s818_s17 }
 0x33d   : > { %p11_p7 = scmp.ge.s32.totalorder %s14_s19, 10   ;;  %s940_s16 = smov %s822_s18 }
 0x33e   : > { %s941_s17 = smov %s944_s20  ;;  %s942_s18 = smov %s948_s21 }
 0x33f   :  { %13 = sbr.rel (!%p11_p7) target bundleno = 3 (0x3), region = 83 }

</bundles_post_ra>
